<compile_context>
chip_gen: v7x
topology: tpu7x:2x2x1
jax: 0.10.0
libtpu: 0.0.40
codegen_flags: <defaults>
</compile_context>

<pallas_src>
import functools

import jax
import jax.numpy as jnp
from jax import lax
from jax.experimental import pallas as pl
from jax.experimental.pallas import tpu as pltpu


def _layer_norm(v, w, b, eps=1e-5):
    mu = jnp.mean(v, axis=-1, keepdims=True)
    var = jnp.mean((v - mu) ** 2, axis=-1, keepdims=True)
    return (v - mu) * lax.rsqrt(var + eps) * w + b


def residual_attention_block_kernel(
    x_ref,
    ln1_w_ref, ln1_b_ref,
    w_qkv_ref, b_qkv_ref,
    w_out_ref, b_out_ref,
    ln2_w_ref, ln2_b_ref,
    w_fc_ref, b_fc_ref,
    w_proj_ref, b_proj_ref,
    o_ref,
    attn_sc, x1_sc, ln2_sc, acc_sc,
    *, n_head: int,
):
    f32 = jnp.float32
    bf16 = jnp.bfloat16
    hc = pl.program_id(1)
    n_hc = pl.num_programs(1)

    # ---- attention + residual + LN2: once per batch element (first hidden chunk) ----
    @pl.when(hc == 0)
    def _attention_and_init():
        x = x_ref[0]                                   # (S, D) f32
        S, D = x.shape
        hd = D // n_head

        ln1 = _layer_norm(x, ln1_w_ref[...], ln1_b_ref[...])
        # in_proj: weights pre-transposed (D, 3D), Q-scale folded in; bf16 cast once.
        qkv = (jnp.dot(ln1.astype(bf16), w_qkv_ref[...],
                       preferred_element_type=f32) + b_qkv_ref[...]).astype(bf16)
        q = qkv[:, :D]
        k = qkv[:, D:2 * D]
        v = qkv[:, 2 * D:]

        # Per-head attention; each head's output lands in the (S, D) bf16 scratch at its
        # column offset so out_proj can run as a single K=D matmul afterwards.
        for h in range(n_head):                        # static unrolled loop over heads
            lo = h * hd
            qh = q[:, lo:lo + hd]                      # pre-scaled q (bf16)
            kh = k[:, lo:lo + hd]
            vh = v[:, lo:lo + hd]
            # scores = q_h @ k_h^T  (contraction on last dim of both -> no transpose op)
            s = lax.dot_general(qh, kh, (((1,), (1,)), ((), ())),
                                preferred_element_type=f32)          # (S, S) f32
            s = s - jnp.max(s, axis=-1, keepdims=True)
            e = jnp.exp(s)
            p = e * pl.reciprocal(jnp.sum(e, axis=-1, keepdims=True), approx=True)
            ho = jnp.dot(p.astype(bf16), vh, preferred_element_type=f32)  # (S, hd)
            attn_sc[:, lo:lo + hd] = ho.astype(bf16)

        attn = jnp.dot(attn_sc[...], w_out_ref[...],
                       preferred_element_type=f32) + b_out_ref[...]       # (S, D)
        x1 = x + attn
        x1_sc[...] = x1
        ln2_sc[...] = _layer_norm(x1, ln2_w_ref[...], ln2_b_ref[...]).astype(bf16)
        acc_sc[...] = jnp.zeros_like(acc_sc)

    # ---- MLP: one hidden-dim chunk per grid step (c_fc -> QuickGELU -> c_proj) ----
    h1 = jnp.dot(ln2_sc[...], w_fc_ref[...],
                 preferred_element_type=f32) + b_fc_ref[...]              # (S, chunk) f32
    h1 = h1 * jax.nn.sigmoid(1.702 * h1)               # QuickGELU, fp32 (v5e-safe)
    acc_sc[...] += jnp.dot(h1.astype(bf16), w_proj_ref[...],
                           preferred_element_type=f32)                    # (S, D) f32

    @pl.when(hc == n_hc - 1)
    def _finalize():
        o_ref[0] = x1_sc[...] + acc_sc[...] + b_proj_ref[...]


def _pick_hidden_chunk(ff):
    """Largest lane-aligned chunk (<=2048) that divides the MLP hidden dim."""
    if ff <= 2048:
        return ff
    for cand in (2048, 1024, 512, 256, 128):
        if ff % cand == 0:
            return cand
    return ff


def _vmem_limit_bytes(S, D, hc_chunk):
    """Shape-aware VMEM budget (worst-case 2x buffering), capped by the chip's capacity."""
    bf, f4 = 2, 4
    const_bytes = 2 * ((3 * D * D + D * D) * bf + (3 * D + 7 * D) * f4)      # resident weights/biases
    stream_bytes = 2 * ((D * hc_chunk + hc_chunk * D) * bf + hc_chunk * f4)  # streamed MLP chunks
    io_bytes = 2 * 2 * S * D * f4                                            # x block + out block
    scratch_bytes = 2 * S * D * bf + 2 * S * D * f4                          # persistent scratch
    trans_bytes = S * 3 * D * bf + S * S * f4 + 2 * S * hc_chunk * f4        # transient intermediates
    total = const_bytes + stream_bytes + io_bytes + scratch_bytes + trans_bytes
    total = int(total * 1.5) + (4 << 20)                                     # compiler headroom
    cap = 100 << 20                                                          # v5e/v6e: 128 MiB physical
    try:
        cap = int(pltpu.get_tpu_info().vmem_capacity_bytes * 3 // 4)         # v7x: 64 MiB/TC
    except Exception:
        pass
    return max(16 << 20, min(total, cap))


def residual_attention_block(x_snd, params, n_head):
    """x_snd: (seq, batch, d_model) fp32 -> (seq, batch, d_model) fp32."""
    S, N, D = x_snd.shape
    hd = D // n_head
    ff = 4 * D
    hc_chunk = _pick_hidden_chunk(ff)
    n_hc = ff // hc_chunk
    scale = 1.0 / float(hd) ** 0.5
    p = params

    # One-time wrapper-side layout plumbing:
    #   - transpose all PyTorch (out, in) weights to (in, out)
    #   - fold 1/sqrt(head_dim) into the Q third of in_proj (weight + bias)
    #   - cast matmul weights to bf16 (MXU full rate; accumulation stays f32)
    q_scale = jnp.concatenate(
        [jnp.full((D,), scale, jnp.float32), jnp.ones((2 * D,), jnp.float32)])
    w_qkv = (p["in_proj_w"].T * q_scale[None, :]).astype(jnp.bfloat16)   # (D, 3D)
    b_qkv = (p["in_proj_b"] * q_scale[None, :]).astype(jnp.float32)      # (1, 3D)
    w_out = p["out_proj_w"].T.astype(jnp.bfloat16)                       # (D, D)
    w_fc = p["fc_w"].T.astype(jnp.bfloat16)                              # (D, 4D)
    w_proj = p["proj_w"].T.astype(jnp.bfloat16)                          # (4D, D)

    # Boundary transposes kept because the module interface is (L, N, E); a multi-block
    # stack should stay batch-major and transpose once at the model boundary.
    x = jnp.transpose(x_snd, (1, 0, 2))                                  # (N, S, D)

    operands = (
        x,
        p["ln1_w"], p["ln1_b"],
        w_qkv, b_qkv,
        w_out, p["out_proj_b"],
        p["ln2_w"], p["ln2_b"],
        w_fc, p["fc_b"],
        w_proj, p["proj_b"],
    )

    kernel = functools.partial(residual_attention_block_kernel, n_head=n_head)

    flops = int(2 * N * S * (12 * D * D + 2 * S * D))
    transc = int(N * (n_head * S * S + S * ff))
    weight_bytes = 2 * (3 * D * D + D * D + 2 * D * ff) + 4 * (3 * D + 7 * D + ff)
    cost = pl.CostEstimate(flops=flops, transcendentals=transc,
                           bytes_accessed=int(weight_bytes + 2 * N * S * D * 4))
    vmem_limit = _vmem_limit_bytes(S, D, hc_chunk)

    def const_spec(shape, single_buffer):
        zeros = (0,) * len(shape)
        idx = lambda b, hc: zeros
        if single_buffer and hasattr(pl, "Buffered"):
            try:
                # Grid-invariant operand: ask for a single VMEM buffer (never re-fetched).
                return pl.BlockSpec(shape, idx, pipeline_mode=pl.Buffered(1))
            except Exception:
                pass
        return pl.BlockSpec(shape, idx)

    def run(single_buffer):
        cs = lambda shape: const_spec(shape, single_buffer)
        in_specs = [
            pl.BlockSpec((1, S, D), lambda b, hc: (b, 0, 0)),            # x
            cs((1, D)), cs((1, D)),                                      # ln_1
            cs((D, 3 * D)), cs((1, 3 * D)),                              # in_proj
            cs((D, D)), cs((1, D)),                                      # out_proj
            cs((1, D)), cs((1, D)),                                      # ln_2
            pl.BlockSpec((D, hc_chunk), lambda b, hc: (0, hc)),          # c_fc chunk
            pl.BlockSpec((1, hc_chunk), lambda b, hc: (0, hc)),          # c_fc bias chunk
            pl.BlockSpec((hc_chunk, D), lambda b, hc: (hc, 0)),          # c_proj chunk
            cs((1, D)),                                                  # c_proj bias
        ]
        return pl.pallas_call(
            kernel,
            out_shape=jax.ShapeDtypeStruct((N, S, D), jnp.float32),
            grid_spec=pltpu.PrefetchScalarGridSpec(
                num_scalar_prefetch=0,
                grid=(N, n_hc),                       # batch (parallel) x MLP-hidden chunks
                in_specs=in_specs,
                out_specs=pl.BlockSpec((1, S, D), lambda b, hc: (b, 0, 0)),
                scratch_shapes=[
                    pltpu.VMEM((S, D), jnp.bfloat16),   # packed per-head attention output
                    pltpu.VMEM((S, D), jnp.float32),    # x1 = x + attention residual
                    pltpu.VMEM((S, D), jnp.bfloat16),   # LN2(x1), matmul-ready
                    pltpu.VMEM((S, D), jnp.float32),    # MLP output accumulator
                ]),
            compiler_params=pltpu.CompilerParams(
                dimension_semantics=("parallel", "arbitrary"),
                vmem_limit_bytes=vmem_limit),
            cost_estimate=cost,
        )(*operands)

    if hasattr(pl, "Buffered"):
        try:
            out = run(True)
        except Exception:
            out = run(False)   # jax version without pipeline_mode support for pallas_call
    else:
        out = run(False)
    return jnp.transpose(out, (1, 0, 2))                                 # back to (S, N, D)


def init_params(key, d_model):
    D = d_model
    ks = jax.random.split(key, 12)
    n = lambda k, s, sc=0.02: sc * jax.random.normal(k, s, dtype=jnp.float32)
    return {
        # LayerNorm / bias params stored as (1, D) rows for lane-friendly VMEM layout
        "ln1_w": 1.0 + n(ks[0], (1, D), 0.1), "ln1_b": n(ks[1], (1, D), 0.1),
        "in_proj_w": n(ks[2], (3 * D, D)),    "in_proj_b": n(ks[3], (1, 3 * D)),
        "out_proj_w": n(ks[4], (D, D)),       "out_proj_b": n(ks[5], (1, D)),
        "ln2_w": 1.0 + n(ks[6], (1, D), 0.1), "ln2_b": n(ks[7], (1, D), 0.1),
        "fc_w": n(ks[8], (4 * D, D)),         "fc_b": n(ks[9], (1, 4 * D)),
        "proj_w": n(ks[10], (D, 4 * D)),      "proj_b": n(ks[11], (1, D)),
    }


def _reference_block(x_snd, p, n_head):
    """Pure-JAX fp32 reference matching the PyTorch module (attn_mask=None)."""
    S, N, D = x_snd.shape
    hd = D // n_head

    def ln(v, w, b):
        mu = v.mean(-1, keepdims=True)
        var = ((v - mu) ** 2).mean(-1, keepdims=True)
        return (v - mu) / jnp.sqrt(var + 1e-5) * w + b

    x = jnp.transpose(x_snd, (1, 0, 2))                               # (N, S, D)
    ln1 = ln(x, p["ln1_w"][0], p["ln1_b"][0])
    qkv = ln1 @ p["in_proj_w"].T + p["in_proj_b"][0]
    q, k, v = qkv[..., :D], qkv[..., D:2 * D], qkv[..., 2 * D:]

    def split(t):
        return t.reshape(N, S, n_head, hd).transpose(0, 2, 1, 3)      # (N, H, S, hd)

    qh = split(q) * (1.0 / hd ** 0.5)
    kh, vh = split(k), split(v)
    s = jnp.einsum("nhqd,nhkd->nhqk", qh, kh)
    pr = jax.nn.softmax(s, axis=-1)
    o = jnp.einsum("nhqk,nhkd->nhqd", pr, vh).transpose(0, 2, 1, 3).reshape(N, S, D)
    x1 = x + (o @ p["out_proj_w"].T + p["out_proj_b"][0])

    ln2 = ln(x1, p["ln2_w"][0], p["ln2_b"][0])
    h1 = ln2 @ p["fc_w"].T + p["fc_b"][0]
    h1 = h1 * jax.nn.sigmoid(1.702 * h1)
    out = x1 + (h1 @ p["proj_w"].T + p["proj_b"][0])
    return jnp.transpose(out, (1, 0, 2))                              # (S, N, D)


if __name__ == "__main__":
    S, N, D, H = 8, 2, 32, 4                               # seq, batch, d_model, heads
    key = jax.random.PRNGKey(0)
    kx, kp = jax.random.split(key)
    x = jax.random.normal(kx, (S, N, D), dtype=jnp.float32)  # PyTorch (L, N, E) layout
    params = init_params(kp, D)

    out = residual_attention_block(x, params, n_head=H)
    jax.block_until_ready(out)
    assert out.shape == (S, N, D) and out.dtype == jnp.float32
    assert bool(jnp.all(jnp.isfinite(out)))

    ref = _reference_block(x, params, H)
    max_err = jnp.max(jnp.abs(out - ref))
    assert bool(max_err < 5e-2), f"max abs err vs fp32 reference: {max_err}"
    print("KERNEL_OK")
</pallas_src>

<mosaic_0001>
module attributes {stable_mosaic.version = 11 : i64} {
  func.func @residual_attention_block_kernel(%arg0: i32, %arg1: i32, %arg2: memref<1x8x32xf32, #tpu.memory_space<vmem>>, %arg3: memref<1x32xf32, #tpu.memory_space<vmem>>, %arg4: memref<1x32xf32, #tpu.memory_space<vmem>>, %arg5: memref<32x96xbf16, #tpu.memory_space<vmem>>, %arg6: memref<1x96xf32, #tpu.memory_space<vmem>>, %arg7: memref<32x32xbf16, #tpu.memory_space<vmem>>, %arg8: memref<1x32xf32, #tpu.memory_space<vmem>>, %arg9: memref<1x32xf32, #tpu.memory_space<vmem>>, %arg10: memref<1x32xf32, #tpu.memory_space<vmem>>, %arg11: memref<32x128xbf16, #tpu.memory_space<vmem>>, %arg12: memref<1x128xf32, #tpu.memory_space<vmem>>, %arg13: memref<128x32xbf16, #tpu.memory_space<vmem>>, %arg14: memref<1x32xf32, #tpu.memory_space<vmem>>, %arg15: memref<1x8x32xf32, #tpu.memory_space<vmem>>, %arg16: memref<8x32xbf16, #tpu.memory_space<vmem>>, %arg17: memref<8x32xf32, #tpu.memory_space<vmem>>, %arg18: memref<8x32xbf16, #tpu.memory_space<vmem>>, %arg19: memref<8x32xf32, #tpu.memory_space<vmem>>) attributes {dimension_semantics = [#tpu.dimension_semantics<parallel>, #tpu.dimension_semantics<arbitrary>], iteration_bounds = array<i64: 2, 1>, scalar_prefetch = 0 : i64, scratch_operands = 4 : i64, tpu.core_type = #tpu.core_type<tc>, window_params = [{transform_indices = @transform_0, window_bounds = array<i64: 1, 8, 32>}, {pipeline_mode = #tpu.pipeline_mode<synchronous>, transform_indices = @transform_1, window_bounds = array<i64: 1, 32>}, {pipeline_mode = #tpu.pipeline_mode<synchronous>, transform_indices = @transform_2, window_bounds = array<i64: 1, 32>}, {pipeline_mode = #tpu.pipeline_mode<synchronous>, transform_indices = @transform_3, window_bounds = array<i64: 32, 96>}, {pipeline_mode = #tpu.pipeline_mode<synchronous>, transform_indices = @transform_4, window_bounds = array<i64: 1, 96>}, {pipeline_mode = #tpu.pipeline_mode<synchronous>, transform_indices = @transform_5, window_bounds = array<i64: 32, 32>}, {pipeline_mode = #tpu.pipeline_mode<synchronous>, transform_indices = @transform_6, window_bounds = array<i64: 1, 32>}, {pipeline_mode = #tpu.pipeline_mode<synchronous>, transform_indices = @transform_7, window_bounds = array<i64: 1, 32>}, {pipeline_mode = #tpu.pipeline_mode<synchronous>, transform_indices = @transform_8, window_bounds = array<i64: 1, 32>}, {transform_indices = @transform_9, window_bounds = array<i64: 32, 128>}, {transform_indices = @transform_10, window_bounds = array<i64: 1, 128>}, {transform_indices = @transform_11, window_bounds = array<i64: 128, 32>}, {pipeline_mode = #tpu.pipeline_mode<synchronous>, transform_indices = @transform_12, window_bounds = array<i64: 1, 32>}, {transform_indices = @transform_13, window_bounds = array<i64: 1, 8, 32>}]} {
    %c0_i32 = arith.constant 0 : i32
    %0 = arith.cmpi eq, %arg1, %c0_i32 : i32
    %1 = arith.extui %0 : i1 to i32
    %c0_i32_0 = arith.constant 0 : i32
    %2 = arith.cmpi ne, %1, %c0_i32_0 : i32
    scf.if %2 {
      %c0_17 = arith.constant 0 : index
      %c0_18 = arith.constant 0 : index
      %c0_19 = arith.constant 0 : index
      %26 = vector.load %arg2[%c0_17, %c0_18, %c0_19] : memref<1x8x32xf32, #tpu.memory_space<vmem>>, vector<1x8x32xf32>
      %27 = vector.shape_cast %26 : vector<1x8x32xf32> to vector<8x32xf32>
      %c0_20 = arith.constant 0 : index
      %c0_21 = arith.constant 0 : index
      %28 = vector.load %arg3[%c0_20, %c0_21] : memref<1x32xf32, #tpu.memory_space<vmem>>, vector<1x32xf32>
      %c0_22 = arith.constant 0 : index
      %c0_23 = arith.constant 0 : index
      %29 = vector.load %arg4[%c0_22, %c0_23] : memref<1x32xf32, #tpu.memory_space<vmem>>, vector<1x32xf32>
      %cst_24 = arith.constant dense<0.000000e+00> : vector<8xf32>
      %30 = vector.multi_reduction <add>, %27, %cst_24 [1] : vector<8x32xf32> to vector<8xf32>
      %31 = vector.shape_cast %30 : vector<8xf32> to vector<8x1xf32>
      %cst_25 = arith.constant 3.200000e+01 : f32
      %32 = vector.broadcast %cst_25 : f32 to vector<8x1xf32>
      %33 = arith.divf %31, %32 : vector<8x1xf32>
      %34 = vector.broadcast %33 : vector<8x1xf32> to vector<8x32xf32>
      %35 = arith.subf %27, %34 : vector<8x32xf32>
      %36 = arith.mulf %35, %35 : vector<8x32xf32>
      %cst_26 = arith.constant dense<0.000000e+00> : vector<8xf32>
      %37 = vector.multi_reduction <add>, %36, %cst_26 [1] : vector<8x32xf32> to vector<8xf32>
      %38 = vector.shape_cast %37 : vector<8xf32> to vector<8x1xf32>
      %cst_27 = arith.constant 3.200000e+01 : f32
      %39 = vector.broadcast %cst_27 : f32 to vector<8x1xf32>
      %40 = arith.divf %38, %39 : vector<8x1xf32>
      %41 = vector.broadcast %33 : vector<8x1xf32> to vector<8x32xf32>
      %42 = arith.subf %27, %41 : vector<8x32xf32>
      %cst_28 = arith.constant 9.99999974E-6 : f32
      %43 = vector.broadcast %cst_28 : f32 to vector<8x1xf32>
      %44 = arith.addf %40, %43 : vector<8x1xf32>
      %45 = math.rsqrt %44 : vector<8x1xf32>
      %46 = vector.broadcast %45 : vector<8x1xf32> to vector<8x32xf32>
      %47 = arith.mulf %42, %46 : vector<8x32xf32>
      %48 = vector.broadcast %28 : vector<1x32xf32> to vector<8x32xf32>
      %49 = arith.mulf %47, %48 : vector<8x32xf32>
      %50 = vector.broadcast %29 : vector<1x32xf32> to vector<8x32xf32>
      %51 = arith.addf %49, %50 : vector<8x32xf32>
      %52 = arith.truncf %51 : vector<8x32xf32> to vector<8x32xbf16>
      %c0_29 = arith.constant 0 : index
      %c0_30 = arith.constant 0 : index
      %53 = vector.load %arg5[%c0_29, %c0_30] : memref<32x96xbf16, #tpu.memory_space<vmem>>, vector<32x96xbf16>
      %cst_31 = arith.constant dense<0.000000e+00> : vector<8x96xf32>
      %54 = tpu.matmul %52, %53, %cst_31 {dimension_numbers = #tpu.dot_dimension_numbers<[1], [0], [0], [1], [0, 0, 1, 1], [], []>} : vector<8x32xbf16>, vector<32x96xbf16>, vector<8x96xf32> -> vector<8x96xf32>
      %c0_32 = arith.constant 0 : index
      %c0_33 = arith.constant 0 : index
      %55 = vector.load %arg6[%c0_32, %c0_33] : memref<1x96xf32, #tpu.memory_space<vmem>>, vector<1x96xf32>
      %56 = vector.broadcast %55 : vector<1x96xf32> to vector<8x96xf32>
      %57 = arith.addf %54, %56 : vector<8x96xf32>
      %58 = arith.truncf %57 : vector<8x96xf32> to vector<8x96xbf16>
      %59 = vector.extract_strided_slice %58 {offsets = [0, 0], sizes = [8, 32], strides = [1, 1]} : vector<8x96xbf16> to vector<8x32xbf16>
      %60 = vector.extract_strided_slice %58 {offsets = [0, 32], sizes = [8, 32], strides = [1, 1]} : vector<8x96xbf16> to vector<8x32xbf16>
      %61 = vector.extract_strided_slice %58 {offsets = [0, 64], sizes = [8, 32], strides = [1, 1]} : vector<8x96xbf16> to vector<8x32xbf16>
      %62 = vector.extract_strided_slice %59 {offsets = [0, 0], sizes = [8, 8], strides = [1, 1]} : vector<8x32xbf16> to vector<8x8xbf16>
      %63 = vector.extract_strided_slice %60 {offsets = [0, 0], sizes = [8, 8], strides = [1, 1]} : vector<8x32xbf16> to vector<8x8xbf16>
      %64 = vector.extract_strided_slice %61 {offsets = [0, 0], sizes = [8, 8], strides = [1, 1]} : vector<8x32xbf16> to vector<8x8xbf16>
      %cst_34 = arith.constant dense<0.000000e+00> : vector<8x8xf32>
      %65 = tpu.matmul %62, %63, %cst_34 {dimension_numbers = #tpu.dot_dimension_numbers<[1], [1], [0], [0], [0, 0, 1, 0], [], []>} : vector<8x8xbf16>, vector<8x8xbf16>, vector<8x8xf32> -> vector<8x8xf32>
      %cst_35 = arith.constant dense<0xFF800000> : vector<8xf32>
      %66 = vector.multi_reduction <maximumf>, %65, %cst_35 [1] : vector<8x8xf32> to vector<8xf32>
      %67 = vector.shape_cast %66 : vector<8xf32> to vector<8x1xf32>
      %68 = vector.broadcast %67 : vector<8x1xf32> to vector<8x8xf32>
      %69 = arith.subf %65, %68 : vector<8x8xf32>
      %70 = math.exp %69 : vector<8x8xf32>
      %cst_36 = arith.constant dense<0.000000e+00> : vector<8xf32>
      %71 = vector.multi_reduction <add>, %70, %cst_36 [1] : vector<8x8xf32> to vector<8xf32>
      %72 = vector.shape_cast %71 : vector<8xf32> to vector<8x1xf32>
      %73 = tpu.reciprocal %72 {approx = true} : vector<8x1xf32> -> vector<8x1xf32>
      %74 = vector.broadcast %73 : vector<8x1xf32> to vector<8x8xf32>
      %75 = arith.mulf %70, %74 : vector<8x8xf32>
      %76 = arith.truncf %75 : vector<8x8xf32> to vector<8x8xbf16>
      %cst_37 = arith.constant dense<0.000000e+00> : vector<8x8xf32>
      %77 = tpu.matmul %76, %64, %cst_37 {dimension_numbers = #tpu.dot_dimension_numbers<[1], [0], [0], [1], [0, 0, 1, 1], [], []>} : vector<8x8xbf16>, vector<8x8xbf16>, vector<8x8xf32> -> vector<8x8xf32>
      %78 = arith.truncf %77 : vector<8x8xf32> to vector<8x8xbf16>
      %c0_38 = arith.constant 0 : index
      %c0_39 = arith.constant 0 : index
      %79 = vector.load %arg16[%c0_38, %c0_39] : memref<8x32xbf16, #tpu.memory_space<vmem>>, vector<8x8xbf16>
      tpu.vector_store %arg16[%c0_38, %c0_39], %78 {strides = array<i32>} : memref<8x32xbf16, #tpu.memory_space<vmem>>, vector<8x8xbf16>,
      %80 = vector.extract_strided_slice %59 {offsets = [0, 8], sizes = [8, 8], strides = [1, 1]} : vector<8x32xbf16> to vector<8x8xbf16>
      %81 = vector.extract_strided_slice %60 {offsets = [0, 8], sizes = [8, 8], strides = [1, 1]} : vector<8x32xbf16> to vector<8x8xbf16>
      %82 = vector.extract_strided_slice %61 {offsets = [0, 8], sizes = [8, 8], strides = [1, 1]} : vector<8x32xbf16> to vector<8x8xbf16>
      %cst_40 = arith.constant dense<0.000000e+00> : vector<8x8xf32>
      %83 = tpu.matmul %80, %81, %cst_40 {dimension_numbers = #tpu.dot_dimension_numbers<[1], [1], [0], [0], [0, 0, 1, 0], [], []>} : vector<8x8xbf16>, vector<8x8xbf16>, vector<8x8xf32> -> vector<8x8xf32>
      %cst_41 = arith.constant dense<0xFF800000> : vector<8xf32>
      %84 = vector.multi_reduction <maximumf>, %83, %cst_41 [1] : vector<8x8xf32> to vector<8xf32>
      %85 = vector.shape_cast %84 : vector<8xf32> to vector<8x1xf32>
      %86 = vector.broadcast %85 : vector<8x1xf32> to vector<8x8xf32>
      %87 = arith.subf %83, %86 : vector<8x8xf32>
      %88 = math.exp %87 : vector<8x8xf32>
      %cst_42 = arith.constant dense<0.000000e+00> : vector<8xf32>
      %89 = vector.multi_reduction <add>, %88, %cst_42 [1] : vector<8x8xf32> to vector<8xf32>
      %90 = vector.shape_cast %89 : vector<8xf32> to vector<8x1xf32>
      %91 = tpu.reciprocal %90 {approx = true} : vector<8x1xf32> -> vector<8x1xf32>
      %92 = vector.broadcast %91 : vector<8x1xf32> to vector<8x8xf32>
      %93 = arith.mulf %88, %92 : vector<8x8xf32>
      %94 = arith.truncf %93 : vector<8x8xf32> to vector<8x8xbf16>
      %cst_43 = arith.constant dense<0.000000e+00> : vector<8x8xf32>
      %95 = tpu.matmul %94, %82, %cst_43 {dimension_numbers = #tpu.dot_dimension_numbers<[1], [0], [0], [1], [0, 0, 1, 1], [], []>} : vector<8x8xbf16>, vector<8x8xbf16>, vector<8x8xf32> -> vector<8x8xf32>
      %96 = arith.truncf %95 : vector<8x8xf32> to vector<8x8xbf16>
      %c0_44 = arith.constant 0 : index
      %c8 = arith.constant 8 : index
      %97 = vector.load %arg16[%c0_44, %c8] : memref<8x32xbf16, #tpu.memory_space<vmem>>, vector<8x8xbf16>
      tpu.vector_store %arg16[%c0_44, %c8], %96 {strides = array<i32>} : memref<8x32xbf16, #tpu.memory_space<vmem>>, vector<8x8xbf16>,
      %98 = vector.extract_strided_slice %59 {offsets = [0, 16], sizes = [8, 8], strides = [1, 1]} : vector<8x32xbf16> to vector<8x8xbf16>
      %99 = vector.extract_strided_slice %60 {offsets = [0, 16], sizes = [8, 8], strides = [1, 1]} : vector<8x32xbf16> to vector<8x8xbf16>
      %100 = vector.extract_strided_slice %61 {offsets = [0, 16], sizes = [8, 8], strides = [1, 1]} : vector<8x32xbf16> to vector<8x8xbf16>
      %cst_45 = arith.constant dense<0.000000e+00> : vector<8x8xf32>
      %101 = tpu.matmul %98, %99, %cst_45 {dimension_numbers = #tpu.dot_dimension_numbers<[1], [1], [0], [0], [0, 0, 1, 0], [], []>} : vector<8x8xbf16>, vector<8x8xbf16>, vector<8x8xf32> -> vector<8x8xf32>
      %cst_46 = arith.constant dense<0xFF800000> : vector<8xf32>
      %102 = vector.multi_reduction <maximumf>, %101, %cst_46 [1] : vector<8x8xf32> to vector<8xf32>
      %103 = vector.shape_cast %102 : vector<8xf32> to vector<8x1xf32>
      %104 = vector.broadcast %103 : vector<8x1xf32> to vector<8x8xf32>
      %105 = arith.subf %101, %104 : vector<8x8xf32>
      %106 = math.exp %105 : vector<8x8xf32>
      %cst_47 = arith.constant dense<0.000000e+00> : vector<8xf32>
      %107 = vector.multi_reduction <add>, %106, %cst_47 [1] : vector<8x8xf32> to vector<8xf32>
      %108 = vector.shape_cast %107 : vector<8xf32> to vector<8x1xf32>
      %109 = tpu.reciprocal %108 {approx = true} : vector<8x1xf32> -> vector<8x1xf32>
      %110 = vector.broadcast %109 : vector<8x1xf32> to vector<8x8xf32>
      %111 = arith.mulf %106, %110 : vector<8x8xf32>
      %112 = arith.truncf %111 : vector<8x8xf32> to vector<8x8xbf16>
      %cst_48 = arith.constant dense<0.000000e+00> : vector<8x8xf32>
      %113 = tpu.matmul %112, %100, %cst_48 {dimension_numbers = #tpu.dot_dimension_numbers<[1], [0], [0], [1], [0, 0, 1, 1], [], []>} : vector<8x8xbf16>, vector<8x8xbf16>, vector<8x8xf32> -> vector<8x8xf32>
      %114 = arith.truncf %113 : vector<8x8xf32> to vector<8x8xbf16>
      %c0_49 = arith.constant 0 : index
      %c16 = arith.constant 16 : index
      %115 = vector.load %arg16[%c0_49, %c16] : memref<8x32xbf16, #tpu.memory_space<vmem>>, vector<8x8xbf16>
      tpu.vector_store %arg16[%c0_49, %c16], %114 {strides = array<i32>} : memref<8x32xbf16, #tpu.memory_space<vmem>>, vector<8x8xbf16>,
      %116 = vector.extract_strided_slice %59 {offsets = [0, 24], sizes = [8, 8], strides = [1, 1]} : vector<8x32xbf16> to vector<8x8xbf16>
      %117 = vector.extract_strided_slice %60 {offsets = [0, 24], sizes = [8, 8], strides = [1, 1]} : vector<8x32xbf16> to vector<8x8xbf16>
      %118 = vector.extract_strided_slice %61 {offsets = [0, 24], sizes = [8, 8], strides = [1, 1]} : vector<8x32xbf16> to vector<8x8xbf16>
      %cst_50 = arith.constant dense<0.000000e+00> : vector<8x8xf32>
      %119 = tpu.matmul %116, %117, %cst_50 {dimension_numbers = #tpu.dot_dimension_numbers<[1], [1], [0], [0], [0, 0, 1, 0], [], []>} : vector<8x8xbf16>, vector<8x8xbf16>, vector<8x8xf32> -> vector<8x8xf32>
      %cst_51 = arith.constant dense<0xFF800000> : vector<8xf32>
      %120 = vector.multi_reduction <maximumf>, %119, %cst_51 [1] : vector<8x8xf32> to vector<8xf32>
      %121 = vector.shape_cast %120 : vector<8xf32> to vector<8x1xf32>
      %122 = vector.broadcast %121 : vector<8x1xf32> to vector<8x8xf32>
      %123 = arith.subf %119, %122 : vector<8x8xf32>
      %124 = math.exp %123 : vector<8x8xf32>
      %cst_52 = arith.constant dense<0.000000e+00> : vector<8xf32>
      %125 = vector.multi_reduction <add>, %124, %cst_52 [1] : vector<8x8xf32> to vector<8xf32>
      %126 = vector.shape_cast %125 : vector<8xf32> to vector<8x1xf32>
      %127 = tpu.reciprocal %126 {approx = true} : vector<8x1xf32> -> vector<8x1xf32>
      %128 = vector.broadcast %127 : vector<8x1xf32> to vector<8x8xf32>
      %129 = arith.mulf %124, %128 : vector<8x8xf32>
      %130 = arith.truncf %129 : vector<8x8xf32> to vector<8x8xbf16>
      %cst_53 = arith.constant dense<0.000000e+00> : vector<8x8xf32>
      %131 = tpu.matmul %130, %118, %cst_53 {dimension_numbers = #tpu.dot_dimension_numbers<[1], [0], [0], [1], [0, 0, 1, 1], [], []>} : vector<8x8xbf16>, vector<8x8xbf16>, vector<8x8xf32> -> vector<8x8xf32>
      %132 = arith.truncf %131 : vector<8x8xf32> to vector<8x8xbf16>
      %c0_54 = arith.constant 0 : index
      %c24 = arith.constant 24 : index
      %133 = vector.load %arg16[%c0_54, %c24] : memref<8x32xbf16, #tpu.memory_space<vmem>>, vector<8x8xbf16>
      tpu.vector_store %arg16[%c0_54, %c24], %132 {strides = array<i32>} : memref<8x32xbf16, #tpu.memory_space<vmem>>, vector<8x8xbf16>,
      %c0_55 = arith.constant 0 : index
      %c0_56 = arith.constant 0 : index
      %134 = vector.load %arg16[%c0_55, %c0_56] : memref<8x32xbf16, #tpu.memory_space<vmem>>, vector<8x32xbf16>
      %c0_57 = arith.constant 0 : index
      %c0_58 = arith.constant 0 : index
      %135 = vector.load %arg7[%c0_57, %c0_58] : memref<32x32xbf16, #tpu.memory_space<vmem>>, vector<32x32xbf16>
      %cst_59 = arith.constant dense<0.000000e+00> : vector<8x32xf32>
      %136 = tpu.matmul %134, %135, %cst_59 {dimension_numbers = #tpu.dot_dimension_numbers<[1], [0], [0], [1], [0, 0, 1, 1], [], []>} : vector<8x32xbf16>, vector<32x32xbf16>, vector<8x32xf32> -> vector<8x32xf32>
      %c0_60 = arith.constant 0 : index
      %c0_61 = arith.constant 0 : index
      %137 = vector.load %arg8[%c0_60, %c0_61] : memref<1x32xf32, #tpu.memory_space<vmem>>, vector<1x32xf32>
      %138 = vector.broadcast %137 : vector<1x32xf32> to vector<8x32xf32>
      %139 = arith.addf %136, %138 : vector<8x32xf32>
      %140 = arith.addf %27, %139 : vector<8x32xf32>
      %c0_62 = arith.constant 0 : index
      %c0_63 = arith.constant 0 : index
      %141 = vector.load %arg17[%c0_62, %c0_63] : memref<8x32xf32, #tpu.memory_space<vmem>>, vector<8x32xf32>
      tpu.vector_store %arg17[%c0_62, %c0_63], %140 {strides = array<i32>} : memref<8x32xf32, #tpu.memory_space<vmem>>, vector<8x32xf32>,
      %c0_64 = arith.constant 0 : index
      %c0_65 = arith.constant 0 : index
      %142 = vector.load %arg9[%c0_64, %c0_65] : memref<1x32xf32, #tpu.memory_space<vmem>>, vector<1x32xf32>
      %c0_66 = arith.constant 0 : index
      %c0_67 = arith.constant 0 : index
      %143 = vector.load %arg10[%c0_66, %c0_67] : memref<1x32xf32, #tpu.memory_space<vmem>>, vector<1x32xf32>
      %cst_68 = arith.constant dense<0.000000e+00> : vector<8xf32>
      %144 = vector.multi_reduction <add>, %140, %cst_68 [1] : vector<8x32xf32> to vector<8xf32>
      %145 = vector.shape_cast %144 : vector<8xf32> to vector<8x1xf32>
      %cst_69 = arith.constant 3.200000e+01 : f32
      %146 = vector.broadcast %cst_69 : f32 to vector<8x1xf32>
      %147 = arith.divf %145, %146 : vector<8x1xf32>
      %148 = vector.broadcast %147 : vector<8x1xf32> to vector<8x32xf32>
      %149 = arith.subf %140, %148 : vector<8x32xf32>
      %150 = arith.mulf %149, %149 : vector<8x32xf32>
      %cst_70 = arith.constant dense<0.000000e+00> : vector<8xf32>
      %151 = vector.multi_reduction <add>, %150, %cst_70 [1] : vector<8x32xf32> to vector<8xf32>
      %152 = vector.shape_cast %151 : vector<8xf32> to vector<8x1xf32>
      %cst_71 = arith.constant 3.200000e+01 : f32
      %153 = vector.broadcast %cst_71 : f32 to vector<8x1xf32>
      %154 = arith.divf %152, %153 : vector<8x1xf32>
      %155 = vector.broadcast %147 : vector<8x1xf32> to vector<8x32xf32>
      %156 = arith.subf %140, %155 : vector<8x32xf32>
      %cst_72 = arith.constant 9.99999974E-6 : f32
      %157 = vector.broadcast %cst_72 : f32 to vector<8x1xf32>
      %158 = arith.addf %154, %157 : vector<8x1xf32>
      %159 = math.rsqrt %158 : vector<8x1xf32>
      %160 = vector.broadcast %159 : vector<8x1xf32> to vector<8x32xf32>
      %161 = arith.mulf %156, %160 : vector<8x32xf32>
      %162 = vector.broadcast %142 : vector<1x32xf32> to vector<8x32xf32>
      %163 = arith.mulf %161, %162 : vector<8x32xf32>
      %164 = vector.broadcast %143 : vector<1x32xf32> to vector<8x32xf32>
      %165 = arith.addf %163, %164 : vector<8x32xf32>
      %166 = arith.truncf %165 : vector<8x32xf32> to vector<8x32xbf16>
      %c0_73 = arith.constant 0 : index
      %c0_74 = arith.constant 0 : index
      %167 = vector.load %arg18[%c0_73, %c0_74] : memref<8x32xbf16, #tpu.memory_space<vmem>>, vector<8x32xbf16>
      tpu.vector_store %arg18[%c0_73, %c0_74], %166 {strides = array<i32>} : memref<8x32xbf16, #tpu.memory_space<vmem>>, vector<8x32xbf16>,
      %cst_75 = arith.constant 0.000000e+00 : f32
      %168 = vector.broadcast %cst_75 : f32 to vector<8x32xf32>
      %c0_76 = arith.constant 0 : index
      %c0_77 = arith.constant 0 : index
      %169 = vector.load %arg19[%c0_76, %c0_77] : memref<8x32xf32, #tpu.memory_space<vmem>>, vector<8x32xf32>
      tpu.vector_store %arg19[%c0_76, %c0_77], %168 {strides = array<i32>} : memref<8x32xf32, #tpu.memory_space<vmem>>, vector<8x32xf32>,
    } else {
    }
    %c0 = arith.constant 0 : index
    %c0_1 = arith.constant 0 : index
    %3 = vector.load %arg18[%c0, %c0_1] : memref<8x32xbf16, #tpu.memory_space<vmem>>, vector<8x32xbf16>
    %c0_2 = arith.constant 0 : index
    %c0_3 = arith.constant 0 : index
    %4 = vector.load %arg11[%c0_2, %c0_3] : memref<32x128xbf16, #tpu.memory_space<vmem>>, vector<32x128xbf16>
    %cst = arith.constant dense<0.000000e+00> : vector<8x128xf32>
    %5 = tpu.matmul %3, %4, %cst {dimension_numbers = #tpu.dot_dimension_numbers<[1], [0], [0], [1], [0, 0, 1, 1], [], []>} : vector<8x32xbf16>, vector<32x128xbf16>, vector<8x128xf32> -> vector<8x128xf32>
    %c0_4 = arith.constant 0 : index
    %c0_5 = arith.constant 0 : index
    %6 = vector.load %arg12[%c0_4, %c0_5] : memref<1x128xf32, #tpu.memory_space<vmem>>, vector<1x128xf32>
    %7 = vector.broadcast %6 : vector<1x128xf32> to vector<8x128xf32>
    %8 = arith.addf %5, %7 : vector<8x128xf32>
    %cst_6 = arith.constant 1.702000e+00 : f32
    %9 = vector.broadcast %cst_6 : f32 to vector<8x128xf32>
    %10 = arith.mulf %9, %8 : vector<8x128xf32>
    %11 = arith.negf %10 : vector<8x128xf32>
    %12 = math.exp %11 : vector<8x128xf32>
    %cst_7 = arith.constant 1.000000e+00 : f32
    %13 = vector.broadcast %cst_7 : f32 to vector<8x128xf32>
    %14 = arith.addf %13, %12 : vector<8x128xf32>
    %15 = arith.divf %13, %14 : vector<8x128xf32>
    %16 = arith.mulf %8, %15 : vector<8x128xf32>
    %c0_8 = arith.constant 0 : index
    %c0_9 = arith.constant 0 : index
    %17 = vector.load %arg19[%c0_8, %c0_9] : memref<8x32xf32, #tpu.memory_space<vmem>>, vector<8x32xf32>
    %18 = arith.truncf %16 : vector<8x128xf32> to vector<8x128xbf16>
    %c0_10 = arith.constant 0 : index
    %c0_11 = arith.constant 0 : index
    %19 = vector.load %arg13[%c0_10, %c0_11] : memref<128x32xbf16, #tpu.memory_space<vmem>>, vector<128x32xbf16>
    %cst_12 = arith.constant dense<0.000000e+00> : vector<8x32xf32>
    %20 = tpu.matmul %18, %19, %cst_12 {dimension_numbers = #tpu.dot_dimension_numbers<[1], [0], [0], [1], [0, 0, 1, 1], [], []>} : vector<8x128xbf16>, vector<128x32xbf16>, vector<8x32xf32> -> vector<8x32xf32>
    %21 = arith.addf %17, %20 : vector<8x32xf32>
    %c0_13 = arith.constant 0 : index
    %c0_14 = arith.constant 0 : index
    %22 = vector.load %arg19[%c0_13, %c0_14] : memref<8x32xf32, #tpu.memory_space<vmem>>, vector<8x32xf32>
    tpu.vector_store %arg19[%c0_13, %c0_14], %21 {strides = array<i32>} : memref<8x32xf32, #tpu.memory_space<vmem>>, vector<8x32xf32>,
    %c0_i32_15 = arith.constant 0 : i32
    %23 = arith.cmpi eq, %arg1, %c0_i32_15 : i32
    %24 = arith.extui %23 : i1 to i32
    %c0_i32_16 = arith.constant 0 : i32
    %25 = arith.cmpi ne, %24, %c0_i32_16 : i32
    scf.if %25 {
      %c0_17 = arith.constant 0 : index
      %c0_18 = arith.constant 0 : index
      %26 = vector.load %arg17[%c0_17, %c0_18] : memref<8x32xf32, #tpu.memory_space<vmem>>, vector<8x32xf32>
      %c0_19 = arith.constant 0 : index
      %c0_20 = arith.constant 0 : index
      %27 = vector.load %arg19[%c0_19, %c0_20] : memref<8x32xf32, #tpu.memory_space<vmem>>, vector<8x32xf32>
      %28 = arith.addf %26, %27 : vector<8x32xf32>
      %c0_21 = arith.constant 0 : index
      %c0_22 = arith.constant 0 : index
      %29 = vector.load %arg14[%c0_21, %c0_22] : memref<1x32xf32, #tpu.memory_space<vmem>>, vector<1x32xf32>
      %30 = vector.broadcast %29 : vector<1x32xf32> to vector<8x32xf32>
      %31 = arith.addf %28, %30 : vector<8x32xf32>
      %c0_23 = arith.constant 0 : index
      %c0_24 = arith.constant 0 : index
      %c0_25 = arith.constant 0 : index
      %32 = vector.load %arg15[%c0_23, %c0_24, %c0_25] : memref<1x8x32xf32, #tpu.memory_space<vmem>>, vector<1x8x32xf32>
      %33 = vector.shape_cast %32 : vector<1x8x32xf32> to vector<8x32xf32>
      %34 = vector.shape_cast %31 : vector<8x32xf32> to vector<1x8x32xf32>
      tpu.vector_store %arg15[%c0_23, %c0_24, %c0_25], %34 {strides = array<i32>} : memref<1x8x32xf32, #tpu.memory_space<vmem>>, vector<1x8x32xf32>,
    } else {
    }
    return
  }
  func.func @transform_0(%arg0: i32, %arg1: i32) -> (i32, i32, i32) {
    %c0_i32 = arith.constant 0 : i32
    %c0_i32_0 = arith.constant 0 : i32
    %c0_i32_1 = arith.constant 0 : i32
    return %arg0, %c0_i32, %c0_i32_0 : i32, i32, i32
  }
  func.func @transform_1(%arg0: i32, %arg1: i32) -> (i32, i32) {
    %c0_i32 = arith.constant 0 : i32
    %c0_i32_0 = arith.constant 0 : i32
    %c0_i32_1 = arith.constant 0 : i32
    return %c0_i32, %c0_i32_0 : i32, i32
  }
  func.func @transform_2(%arg0: i32, %arg1: i32) -> (i32, i32) {
    %c0_i32 = arith.constant 0 : i32
    %c0_i32_0 = arith.constant 0 : i32
    %c0_i32_1 = arith.constant 0 : i32
    return %c0_i32, %c0_i32_0 : i32, i32
  }
  func.func @transform_3(%arg0: i32, %arg1: i32) -> (i32, i32) {
    %c0_i32 = arith.constant 0 : i32
    %c0_i32_0 = arith.constant 0 : i32
    %c0_i32_1 = arith.constant 0 : i32
    return %c0_i32, %c0_i32_0 : i32, i32
  }
  func.func @transform_4(%arg0: i32, %arg1: i32) -> (i32, i32) {
    %c0_i32 = arith.constant 0 : i32
    %c0_i32_0 = arith.constant 0 : i32
    %c0_i32_1 = arith.constant 0 : i32
    return %c0_i32, %c0_i32_0 : i32, i32
  }
  func.func @transform_5(%arg0: i32, %arg1: i32) -> (i32, i32) {
    %c0_i32 = arith.constant 0 : i32
    %c0_i32_0 = arith.constant 0 : i32
    %c0_i32_1 = arith.constant 0 : i32
    return %c0_i32, %c0_i32_0 : i32, i32
  }
  func.func @transform_6(%arg0: i32, %arg1: i32) -> (i32, i32) {
    %c0_i32 = arith.constant 0 : i32
    %c0_i32_0 = arith.constant 0 : i32
    %c0_i32_1 = arith.constant 0 : i32
    return %c0_i32, %c0_i32_0 : i32, i32
  }
  func.func @transform_7(%arg0: i32, %arg1: i32) -> (i32, i32) {
    %c0_i32 = arith.constant 0 : i32
    %c0_i32_0 = arith.constant 0 : i32
    %c0_i32_1 = arith.constant 0 : i32
    return %c0_i32, %c0_i32_0 : i32, i32
  }
  func.func @transform_8(%arg0: i32, %arg1: i32) -> (i32, i32) {
    %c0_i32 = arith.constant 0 : i32
    %c0_i32_0 = arith.constant 0 : i32
    %c0_i32_1 = arith.constant 0 : i32
    return %c0_i32, %c0_i32_0 : i32, i32
  }
  func.func @transform_9(%arg0: i32, %arg1: i32) -> (i32, i32) {
    %c0_i32 = arith.constant 0 : i32
    %c0_i32_0 = arith.constant 0 : i32
    return %c0_i32, %arg1 : i32, i32
  }
  func.func @transform_10(%arg0: i32, %arg1: i32) -> (i32, i32) {
    %c0_i32 = arith.constant 0 : i32
    %c0_i32_0 = arith.constant 0 : i32
    return %c0_i32, %arg1 : i32, i32
  }
  func.func @transform_11(%arg0: i32, %arg1: i32) -> (i32, i32) {
    %c0_i32 = arith.constant 0 : i32
    %c0_i32_0 = arith.constant 0 : i32
    return %arg1, %c0_i32 : i32, i32
  }
  func.func @transform_12(%arg0: i32, %arg1: i32) -> (i32, i32) {
    %c0_i32 = arith.constant 0 : i32
    %c0_i32_0 = arith.constant 0 : i32
    %c0_i32_1 = arith.constant 0 : i32
    return %c0_i32, %c0_i32_0 : i32, i32
  }
  func.func @transform_13(%arg0: i32, %arg1: i32) -> (i32, i32, i32) {
    %c0_i32 = arith.constant 0 : i32
    %c0_i32_0 = arith.constant 0 : i32
    %c0_i32_1 = arith.constant 0 : i32
    return %arg0, %c0_i32, %c0_i32_0 : i32, i32, i32
  }
}

module attributes {stable_mosaic.version = 11 : i64} {
  func.func @residual_attention_block_kernel(%arg0: i32, %arg1: i32, %arg2: memref<1x8x32xf32, #tpu.memory_space<vmem>>, %arg3: memref<1x32xf32, #tpu.memory_space<vmem>>, %arg4: memref<1x32xf32, #tpu.memory_space<vmem>>, %arg5: memref<32x96xbf16, #tpu.memory_space<vmem>>, %arg6: memref<1x96xf32, #tpu.memory_space<vmem>>, %arg7: memref<32x32xbf16, #tpu.memory_space<vmem>>, %arg8: memref<1x32xf32, #tpu.memory_space<vmem>>, %arg9: memref<1x32xf32, #tpu.memory_space<vmem>>, %arg10: memref<1x32xf32, #tpu.memory_space<vmem>>, %arg11: memref<32x128xbf16, #tpu.memory_space<vmem>>, %arg12: memref<1x128xf32, #tpu.memory_space<vmem>>, %arg13: memref<128x32xbf16, #tpu.memory_space<vmem>>, %arg14: memref<1x32xf32, #tpu.memory_space<vmem>>, %arg15: memref<1x8x32xf32, #tpu.memory_space<vmem>>, %arg16: memref<8x32xbf16, #tpu.memory_space<vmem>>, %arg17: memref<8x32xf32, #tpu.memory_space<vmem>>, %arg18: memref<8x32xbf16, #tpu.memory_space<vmem>>, %arg19: memref<8x32xf32, #tpu.memory_space<vmem>>) attributes {dimension_semantics = [#tpu.dimension_semantics<parallel>, #tpu.dimension_semantics<arbitrary>], iteration_bounds = array<i64: 2, 1>, scalar_prefetch = 0 : i64, scratch_operands = 4 : i64, tpu.core_type = #tpu.core_type<tc>, window_params = [{transform_indices = @transform_0, window_bounds = array<i64: 1, 8, 32>}, {pipeline_mode = #tpu.pipeline_mode<synchronous>, transform_indices = @transform_1, window_bounds = array<i64: 1, 32>}, {pipeline_mode = #tpu.pipeline_mode<synchronous>, transform_indices = @transform_2, window_bounds = array<i64: 1, 32>}, {pipeline_mode = #tpu.pipeline_mode<synchronous>, transform_indices = @transform_3, window_bounds = array<i64: 32, 96>}, {pipeline_mode = #tpu.pipeline_mode<synchronous>, transform_indices = @transform_4, window_bounds = array<i64: 1, 96>}, {pipeline_mode = #tpu.pipeline_mode<synchronous>, transform_indices = @transform_5, window_bounds = array<i64: 32, 32>}, {pipeline_mode = #tpu.pipeline_mode<synchronous>, transform_indices = @transform_6, window_bounds = array<i64: 1, 32>}, {pipeline_mode = #tpu.pipeline_mode<synchronous>, transform_indices = @transform_7, window_bounds = array<i64: 1, 32>}, {pipeline_mode = #tpu.pipeline_mode<synchronous>, transform_indices = @transform_8, window_bounds = array<i64: 1, 32>}, {transform_indices = @transform_9, window_bounds = array<i64: 32, 128>}, {transform_indices = @transform_10, window_bounds = array<i64: 1, 128>}, {transform_indices = @transform_11, window_bounds = array<i64: 128, 32>}, {pipeline_mode = #tpu.pipeline_mode<synchronous>, transform_indices = @transform_12, window_bounds = array<i64: 1, 32>}, {transform_indices = @transform_13, window_bounds = array<i64: 1, 8, 32>}]} {
    %c0_i32 = arith.constant 0 : i32
    %0 = arith.cmpi eq, %arg1, %c0_i32 : i32
    %1 = arith.extui %0 : i1 to i32
    %c0_i32_0 = arith.constant 0 : i32
    %2 = arith.cmpi ne, %1, %c0_i32_0 : i32
    scf.if %2 {
      %c0_17 = arith.constant 0 : index
      %c0_18 = arith.constant 0 : index
      %c0_19 = arith.constant 0 : index
      %26 = vector.load %arg2[%c0_17, %c0_18, %c0_19] : memref<1x8x32xf32, #tpu.memory_space<vmem>>, vector<1x8x32xf32>
      %27 = vector.shape_cast %26 : vector<1x8x32xf32> to vector<8x32xf32>
      %c0_20 = arith.constant 0 : index
      %c0_21 = arith.constant 0 : index
      %28 = vector.load %arg3[%c0_20, %c0_21] : memref<1x32xf32, #tpu.memory_space<vmem>>, vector<1x32xf32>
      %c0_22 = arith.constant 0 : index
      %c0_23 = arith.constant 0 : index
      %29 = vector.load %arg4[%c0_22, %c0_23] : memref<1x32xf32, #tpu.memory_space<vmem>>, vector<1x32xf32>
      %cst_24 = arith.constant dense<0.000000e+00> : vector<8xf32>
      %30 = vector.multi_reduction <add>, %27, %cst_24 [1] : vector<8x32xf32> to vector<8xf32>
      %31 = vector.shape_cast %30 : vector<8xf32> to vector<8x1xf32>
      %cst_25 = arith.constant 3.200000e+01 : f32
      %32 = vector.broadcast %cst_25 : f32 to vector<8x1xf32>
      %33 = arith.divf %31, %32 : vector<8x1xf32>
      %34 = vector.broadcast %33 : vector<8x1xf32> to vector<8x32xf32>
      %35 = arith.subf %27, %34 : vector<8x32xf32>
      %36 = arith.mulf %35, %35 : vector<8x32xf32>
      %cst_26 = arith.constant dense<0.000000e+00> : vector<8xf32>
      %37 = vector.multi_reduction <add>, %36, %cst_26 [1] : vector<8x32xf32> to vector<8xf32>
      %38 = vector.shape_cast %37 : vector<8xf32> to vector<8x1xf32>
      %cst_27 = arith.constant 3.200000e+01 : f32
      %39 = vector.broadcast %cst_27 : f32 to vector<8x1xf32>
      %40 = arith.divf %38, %39 : vector<8x1xf32>
      %41 = vector.broadcast %33 : vector<8x1xf32> to vector<8x32xf32>
      %42 = arith.subf %27, %41 : vector<8x32xf32>
      %cst_28 = arith.constant 9.99999974E-6 : f32
      %43 = vector.broadcast %cst_28 : f32 to vector<8x1xf32>
      %44 = arith.addf %40, %43 : vector<8x1xf32>
      %45 = math.rsqrt %44 : vector<8x1xf32>
      %46 = vector.broadcast %45 : vector<8x1xf32> to vector<8x32xf32>
      %47 = arith.mulf %42, %46 : vector<8x32xf32>
      %48 = vector.broadcast %28 : vector<1x32xf32> to vector<8x32xf32>
      %49 = arith.mulf %47, %48 : vector<8x32xf32>
      %50 = vector.broadcast %29 : vector<1x32xf32> to vector<8x32xf32>
      %51 = arith.addf %49, %50 : vector<8x32xf32>
      %52 = arith.truncf %51 : vector<8x32xf32> to vector<8x32xbf16>
      %c0_29 = arith.constant 0 : index
      %c0_30 = arith.constant 0 : index
      %53 = vector.load %arg5[%c0_29, %c0_30] : memref<32x96xbf16, #tpu.memory_space<vmem>>, vector<32x96xbf16>
      %cst_31 = arith.constant dense<0.000000e+00> : vector<8x96xf32>
      %54 = tpu.matmul %52, %53, %cst_31 {dimension_numbers = #tpu.dot_dimension_numbers<[1], [0], [0], [1], [0, 0, 1, 1], [], []>} : vector<8x32xbf16>, vector<32x96xbf16>, vector<8x96xf32> -> vector<8x96xf32>
      %c0_32 = arith.constant 0 : index
      %c0_33 = arith.constant 0 : index
      %55 = vector.load %arg6[%c0_32, %c0_33] : memref<1x96xf32, #tpu.memory_space<vmem>>, vector<1x96xf32>
      %56 = vector.broadcast %55 : vector<1x96xf32> to vector<8x96xf32>
      %57 = arith.addf %54, %56 : vector<8x96xf32>
      %58 = arith.truncf %57 : vector<8x96xf32> to vector<8x96xbf16>
      %59 = vector.extract_strided_slice %58 {offsets = [0, 0], sizes = [8, 32], strides = [1, 1]} : vector<8x96xbf16> to vector<8x32xbf16>
      %60 = vector.extract_strided_slice %58 {offsets = [0, 32], sizes = [8, 32], strides = [1, 1]} : vector<8x96xbf16> to vector<8x32xbf16>
      %61 = vector.extract_strided_slice %58 {offsets = [0, 64], sizes = [8, 32], strides = [1, 1]} : vector<8x96xbf16> to vector<8x32xbf16>
      %62 = vector.extract_strided_slice %59 {offsets = [0, 0], sizes = [8, 8], strides = [1, 1]} : vector<8x32xbf16> to vector<8x8xbf16>
      %63 = vector.extract_strided_slice %60 {offsets = [0, 0], sizes = [8, 8], strides = [1, 1]} : vector<8x32xbf16> to vector<8x8xbf16>
      %64 = vector.extract_strided_slice %61 {offsets = [0, 0], sizes = [8, 8], strides = [1, 1]} : vector<8x32xbf16> to vector<8x8xbf16>
      %cst_34 = arith.constant dense<0.000000e+00> : vector<8x8xf32>
      %65 = tpu.matmul %62, %63, %cst_34 {dimension_numbers = #tpu.dot_dimension_numbers<[1], [1], [0], [0], [0, 0, 1, 0], [], []>} : vector<8x8xbf16>, vector<8x8xbf16>, vector<8x8xf32> -> vector<8x8xf32>
      %cst_35 = arith.constant dense<0xFF800000> : vector<8xf32>
      %66 = vector.multi_reduction <maximumf>, %65, %cst_35 [1] : vector<8x8xf32> to vector<8xf32>
      %67 = vector.shape_cast %66 : vector<8xf32> to vector<8x1xf32>
      %68 = vector.broadcast %67 : vector<8x1xf32> to vector<8x8xf32>
      %69 = arith.subf %65, %68 : vector<8x8xf32>
      %70 = math.exp %69 : vector<8x8xf32>
      %cst_36 = arith.constant dense<0.000000e+00> : vector<8xf32>
      %71 = vector.multi_reduction <add>, %70, %cst_36 [1] : vector<8x8xf32> to vector<8xf32>
      %72 = vector.shape_cast %71 : vector<8xf32> to vector<8x1xf32>
      %73 = tpu.reciprocal %72 {approx = true} : vector<8x1xf32> -> vector<8x1xf32>
      %74 = vector.broadcast %73 : vector<8x1xf32> to vector<8x8xf32>
      %75 = arith.mulf %70, %74 : vector<8x8xf32>
      %76 = arith.truncf %75 : vector<8x8xf32> to vector<8x8xbf16>
      %cst_37 = arith.constant dense<0.000000e+00> : vector<8x8xf32>
      %77 = tpu.matmul %76, %64, %cst_37 {dimension_numbers = #tpu.dot_dimension_numbers<[1], [0], [0], [1], [0, 0, 1, 1], [], []>} : vector<8x8xbf16>, vector<8x8xbf16>, vector<8x8xf32> -> vector<8x8xf32>
      %78 = arith.truncf %77 : vector<8x8xf32> to vector<8x8xbf16>
      %c0_38 = arith.constant 0 : index
      %c0_39 = arith.constant 0 : index
      %79 = vector.load %arg16[%c0_38, %c0_39] : memref<8x32xbf16, #tpu.memory_space<vmem>>, vector<8x8xbf16>
      tpu.vector_store %arg16[%c0_38, %c0_39], %78 {strides = array<i32>} : memref<8x32xbf16, #tpu.memory_space<vmem>>, vector<8x8xbf16>,
      %80 = vector.extract_strided_slice %59 {offsets = [0, 8], sizes = [8, 8], strides = [1, 1]} : vector<8x32xbf16> to vector<8x8xbf16>
      %81 = vector.extract_strided_slice %60 {offsets = [0, 8], sizes = [8, 8], strides = [1, 1]} : vector<8x32xbf16> to vector<8x8xbf16>
      %82 = vector.extract_strided_slice %61 {offsets = [0, 8], sizes = [8, 8], strides = [1, 1]} : vector<8x32xbf16> to vector<8x8xbf16>
      %cst_40 = arith.constant dense<0.000000e+00> : vector<8x8xf32>
      %83 = tpu.matmul %80, %81, %cst_40 {dimension_numbers = #tpu.dot_dimension_numbers<[1], [1], [0], [0], [0, 0, 1, 0], [], []>} : vector<8x8xbf16>, vector<8x8xbf16>, vector<8x8xf32> -> vector<8x8xf32>
      %cst_41 = arith.constant dense<0xFF800000> : vector<8xf32>
      %84 = vector.multi_reduction <maximumf>, %83, %cst_41 [1] : vector<8x8xf32> to vector<8xf32>
      %85 = vector.shape_cast %84 : vector<8xf32> to vector<8x1xf32>
      %86 = vector.broadcast %85 : vector<8x1xf32> to vector<8x8xf32>
      %87 = arith.subf %83, %86 : vector<8x8xf32>
      %88 = math.exp %87 : vector<8x8xf32>
      %cst_42 = arith.constant dense<0.000000e+00> : vector<8xf32>
      %89 = vector.multi_reduction <add>, %88, %cst_42 [1] : vector<8x8xf32> to vector<8xf32>
      %90 = vector.shape_cast %89 : vector<8xf32> to vector<8x1xf32>
      %91 = tpu.reciprocal %90 {approx = true} : vector<8x1xf32> -> vector<8x1xf32>
      %92 = vector.broadcast %91 : vector<8x1xf32> to vector<8x8xf32>
      %93 = arith.mulf %88, %92 : vector<8x8xf32>
      %94 = arith.truncf %93 : vector<8x8xf32> to vector<8x8xbf16>
      %cst_43 = arith.constant dense<0.000000e+00> : vector<8x8xf32>
      %95 = tpu.matmul %94, %82, %cst_43 {dimension_numbers = #tpu.dot_dimension_numbers<[1], [0], [0], [1], [0, 0, 1, 1], [], []>} : vector<8x8xbf16>, vector<8x8xbf16>, vector<8x8xf32> -> vector<8x8xf32>
      %96 = arith.truncf %95 : vector<8x8xf32> to vector<8x8xbf16>
      %c0_44 = arith.constant 0 : index
      %c8 = arith.constant 8 : index
      %97 = vector.load %arg16[%c0_44, %c8] : memref<8x32xbf16, #tpu.memory_space<vmem>>, vector<8x8xbf16>
      tpu.vector_store %arg16[%c0_44, %c8], %96 {strides = array<i32>} : memref<8x32xbf16, #tpu.memory_space<vmem>>, vector<8x8xbf16>,
      %98 = vector.extract_strided_slice %59 {offsets = [0, 16], sizes = [8, 8], strides = [1, 1]} : vector<8x32xbf16> to vector<8x8xbf16>
      %99 = vector.extract_strided_slice %60 {offsets = [0, 16], sizes = [8, 8], strides = [1, 1]} : vector<8x32xbf16> to vector<8x8xbf16>
      %100 = vector.extract_strided_slice %61 {offsets = [0, 16], sizes = [8, 8], strides = [1, 1]} : vector<8x32xbf16> to vector<8x8xbf16>
      %cst_45 = arith.constant dense<0.000000e+00> : vector<8x8xf32>
      %101 = tpu.matmul %98, %99, %cst_45 {dimension_numbers = #tpu.dot_dimension_numbers<[1], [1], [0], [0], [0, 0, 1, 0], [], []>} : vector<8x8xbf16>, vector<8x8xbf16>, vector<8x8xf32> -> vector<8x8xf32>
      %cst_46 = arith.constant dense<0xFF800000> : vector<8xf32>
      %102 = vector.multi_reduction <maximumf>, %101, %cst_46 [1] : vector<8x8xf32> to vector<8xf32>
      %103 = vector.shape_cast %102 : vector<8xf32> to vector<8x1xf32>
      %104 = vector.broadcast %103 : vector<8x1xf32> to vector<8x8xf32>
      %105 = arith.subf %101, %104 : vector<8x8xf32>
      %106 = math.exp %105 : vector<8x8xf32>
      %cst_47 = arith.constant dense<0.000000e+00> : vector<8xf32>
      %107 = vector.multi_reduction <add>, %106, %cst_47 [1] : vector<8x8xf32> to vector<8xf32>
      %108 = vector.shape_cast %107 : vector<8xf32> to vector<8x1xf32>
      %109 = tpu.reciprocal %108 {approx = true} : vector<8x1xf32> -> vector<8x1xf32>
      %110 = vector.broadcast %109 : vector<8x1xf32> to vector<8x8xf32>
      %111 = arith.mulf %106, %110 : vector<8x8xf32>
      %112 = arith.truncf %111 : vector<8x8xf32> to vector<8x8xbf16>
      %cst_48 = arith.constant dense<0.000000e+00> : vector<8x8xf32>
      %113 = tpu.matmul %112, %100, %cst_48 {dimension_numbers = #tpu.dot_dimension_numbers<[1], [0], [0], [1], [0, 0, 1, 1], [], []>} : vector<8x8xbf16>, vector<8x8xbf16>, vector<8x8xf32> -> vector<8x8xf32>
      %114 = arith.truncf %113 : vector<8x8xf32> to vector<8x8xbf16>
      %c0_49 = arith.constant 0 : index
      %c16 = arith.constant 16 : index
      %115 = vector.load %arg16[%c0_49, %c16] : memref<8x32xbf16, #tpu.memory_space<vmem>>, vector<8x8xbf16>
      tpu.vector_store %arg16[%c0_49, %c16], %114 {strides = array<i32>} : memref<8x32xbf16, #tpu.memory_space<vmem>>, vector<8x8xbf16>,
      %116 = vector.extract_strided_slice %59 {offsets = [0, 24], sizes = [8, 8], strides = [1, 1]} : vector<8x32xbf16> to vector<8x8xbf16>
      %117 = vector.extract_strided_slice %60 {offsets = [0, 24], sizes = [8, 8], strides = [1, 1]} : vector<8x32xbf16> to vector<8x8xbf16>
      %118 = vector.extract_strided_slice %61 {offsets = [0, 24], sizes = [8, 8], strides = [1, 1]} : vector<8x32xbf16> to vector<8x8xbf16>
      %cst_50 = arith.constant dense<0.000000e+00> : vector<8x8xf32>
      %119 = tpu.matmul %116, %117, %cst_50 {dimension_numbers = #tpu.dot_dimension_numbers<[1], [1], [0], [0], [0, 0, 1, 0], [], []>} : vector<8x8xbf16>, vector<8x8xbf16>, vector<8x8xf32> -> vector<8x8xf32>
      %cst_51 = arith.constant dense<0xFF800000> : vector<8xf32>
      %120 = vector.multi_reduction <maximumf>, %119, %cst_51 [1] : vector<8x8xf32> to vector<8xf32>
      %121 = vector.shape_cast %120 : vector<8xf32> to vector<8x1xf32>
      %122 = vector.broadcast %121 : vector<8x1xf32> to vector<8x8xf32>
      %123 = arith.subf %119, %122 : vector<8x8xf32>
      %124 = math.exp %123 : vector<8x8xf32>
      %cst_52 = arith.constant dense<0.000000e+00> : vector<8xf32>
      %125 = vector.multi_reduction <add>, %124, %cst_52 [1] : vector<8x8xf32> to vector<8xf32>
      %126 = vector.shape_cast %125 : vector<8xf32> to vector<8x1xf32>
      %127 = tpu.reciprocal %126 {approx = true} : vector<8x1xf32> -> vector<8x1xf32>
      %128 = vector.broadcast %127 : vector<8x1xf32> to vector<8x8xf32>
      %129 = arith.mulf %124, %128 : vector<8x8xf32>
      %130 = arith.truncf %129 : vector<8x8xf32> to vector<8x8xbf16>
      %cst_53 = arith.constant dense<0.000000e+00> : vector<8x8xf32>
      %131 = tpu.matmul %130, %118, %cst_53 {dimension_numbers = #tpu.dot_dimension_numbers<[1], [0], [0], [1], [0, 0, 1, 1], [], []>} : vector<8x8xbf16>, vector<8x8xbf16>, vector<8x8xf32> -> vector<8x8xf32>
      %132 = arith.truncf %131 : vector<8x8xf32> to vector<8x8xbf16>
      %c0_54 = arith.constant 0 : index
      %c24 = arith.constant 24 : index
      %133 = vector.load %arg16[%c0_54, %c24] : memref<8x32xbf16, #tpu.memory_space<vmem>>, vector<8x8xbf16>
      tpu.vector_store %arg16[%c0_54, %c24], %132 {strides = array<i32>} : memref<8x32xbf16, #tpu.memory_space<vmem>>, vector<8x8xbf16>,
      %c0_55 = arith.constant 0 : index
      %c0_56 = arith.constant 0 : index
      %134 = vector.load %arg16[%c0_55, %c0_56] : memref<8x32xbf16, #tpu.memory_space<vmem>>, vector<8x32xbf16>
      %c0_57 = arith.constant 0 : index
      %c0_58 = arith.constant 0 : index
      %135 = vector.load %arg7[%c0_57, %c0_58] : memref<32x32xbf16, #tpu.memory_space<vmem>>, vector<32x32xbf16>
      %cst_59 = arith.constant dense<0.000000e+00> : vector<8x32xf32>
      %136 = tpu.matmul %134, %135, %cst_59 {dimension_numbers = #tpu.dot_dimension_numbers<[1], [0], [0], [1], [0, 0, 1, 1], [], []>} : vector<8x32xbf16>, vector<32x32xbf16>, vector<8x32xf32> -> vector<8x32xf32>
      %c0_60 = arith.constant 0 : index
      %c0_61 = arith.constant 0 : index
      %137 = vector.load %arg8[%c0_60, %c0_61] : memref<1x32xf32, #tpu.memory_space<vmem>>, vector<1x32xf32>
      %138 = vector.broadcast %137 : vector<1x32xf32> to vector<8x32xf32>
      %139 = arith.addf %136, %138 : vector<8x32xf32>
      %140 = arith.addf %27, %139 : vector<8x32xf32>
      %c0_62 = arith.constant 0 : index
      %c0_63 = arith.constant 0 : index
      %141 = vector.load %arg17[%c0_62, %c0_63] : memref<8x32xf32, #tpu.memory_space<vmem>>, vector<8x32xf32>
      tpu.vector_store %arg17[%c0_62, %c0_63], %140 {strides = array<i32>} : memref<8x32xf32, #tpu.memory_space<vmem>>, vector<8x32xf32>,
      %c0_64 = arith.constant 0 : index
      %c0_65 = arith.constant 0 : index
      %142 = vector.load %arg9[%c0_64, %c0_65] : memref<1x32xf32, #tpu.memory_space<vmem>>, vector<1x32xf32>
      %c0_66 = arith.constant 0 : index
      %c0_67 = arith.constant 0 : index
      %143 = vector.load %arg10[%c0_66, %c0_67] : memref<1x32xf32, #tpu.memory_space<vmem>>, vector<1x32xf32>
      %cst_68 = arith.constant dense<0.000000e+00> : vector<8xf32>
      %144 = vector.multi_reduction <add>, %140, %cst_68 [1] : vector<8x32xf32> to vector<8xf32>
      %145 = vector.shape_cast %144 : vector<8xf32> to vector<8x1xf32>
      %cst_69 = arith.constant 3.200000e+01 : f32
      %146 = vector.broadcast %cst_69 : f32 to vector<8x1xf32>
      %147 = arith.divf %145, %146 : vector<8x1xf32>
      %148 = vector.broadcast %147 : vector<8x1xf32> to vector<8x32xf32>
      %149 = arith.subf %140, %148 : vector<8x32xf32>
      %150 = arith.mulf %149, %149 : vector<8x32xf32>
      %cst_70 = arith.constant dense<0.000000e+00> : vector<8xf32>
      %151 = vector.multi_reduction <add>, %150, %cst_70 [1] : vector<8x32xf32> to vector<8xf32>
      %152 = vector.shape_cast %151 : vector<8xf32> to vector<8x1xf32>
      %cst_71 = arith.constant 3.200000e+01 : f32
      %153 = vector.broadcast %cst_71 : f32 to vector<8x1xf32>
      %154 = arith.divf %152, %153 : vector<8x1xf32>
      %155 = vector.broadcast %147 : vector<8x1xf32> to vector<8x32xf32>
      %156 = arith.subf %140, %155 : vector<8x32xf32>
      %cst_72 = arith.constant 9.99999974E-6 : f32
      %157 = vector.broadcast %cst_72 : f32 to vector<8x1xf32>
      %158 = arith.addf %154, %157 : vector<8x1xf32>
      %159 = math.rsqrt %158 : vector<8x1xf32>
      %160 = vector.broadcast %159 : vector<8x1xf32> to vector<8x32xf32>
      %161 = arith.mulf %156, %160 : vector<8x32xf32>
      %162 = vector.broadcast %142 : vector<1x32xf32> to vector<8x32xf32>
      %163 = arith.mulf %161, %162 : vector<8x32xf32>
      %164 = vector.broadcast %143 : vector<1x32xf32> to vector<8x32xf32>
      %165 = arith.addf %163, %164 : vector<8x32xf32>
      %166 = arith.truncf %165 : vector<8x32xf32> to vector<8x32xbf16>
      %c0_73 = arith.constant 0 : index
      %c0_74 = arith.constant 0 : index
      %167 = vector.load %arg18[%c0_73, %c0_74] : memref<8x32xbf16, #tpu.memory_space<vmem>>, vector<8x32xbf16>
      tpu.vector_store %arg18[%c0_73, %c0_74], %166 {strides = array<i32>} : memref<8x32xbf16, #tpu.memory_space<vmem>>, vector<8x32xbf16>,
      %cst_75 = arith.constant 0.000000e+00 : f32
      %168 = vector.broadcast %cst_75 : f32 to vector<8x32xf32>
      %c0_76 = arith.constant 0 : index
      %c0_77 = arith.constant 0 : index
      %169 = vector.load %arg19[%c0_76, %c0_77] : memref<8x32xf32, #tpu.memory_space<vmem>>, vector<8x32xf32>
      tpu.vector_store %arg19[%c0_76, %c0_77], %168 {strides = array<i32>} : memref<8x32xf32, #tpu.memory_space<vmem>>, vector<8x32xf32>,
    } else {
    }
    %c0 = arith.constant 0 : index
    %c0_1 = arith.constant 0 : index
    %3 = vector.load %arg18[%c0, %c0_1] : memref<8x32xbf16, #tpu.memory_space<vmem>>, vector<8x32xbf16>
    %c0_2 = arith.constant 0 : index
    %c0_3 = arith.constant 0 : index
    %4 = vector.load %arg11[%c0_2, %c0_3] : memref<32x128xbf16, #tpu.memory_space<vmem>>, vector<32x128xbf16>
    %cst = arith.constant dense<0.000000e+00> : vector<8x128xf32>
    %5 = tpu.matmul %3, %4, %cst {dimension_numbers = #tpu.dot_dimension_numbers<[1], [0], [0], [1], [0, 0, 1, 1], [], []>} : vector<8x32xbf16>, vector<32x128xbf16>, vector<8x128xf32> -> vector<8x128xf32>
    %c0_4 = arith.constant 0 : index
    %c0_5 = arith.constant 0 : index
    %6 = vector.load %arg12[%c0_4, %c0_5] : memref<1x128xf32, #tpu.memory_space<vmem>>, vector<1x128xf32>
    %7 = vector.broadcast %6 : vector<1x128xf32> to vector<8x128xf32>
    %8 = arith.addf %5, %7 : vector<8x128xf32>
    %cst_6 = arith.constant 1.702000e+00 : f32
    %9 = vector.broadcast %cst_6 : f32 to vector<8x128xf32>
    %10 = arith.mulf %9, %8 : vector<8x128xf32>
    %11 = arith.negf %10 : vector<8x128xf32>
    %12 = math.exp %11 : vector<8x128xf32>
    %cst_7 = arith.constant 1.000000e+00 : f32
    %13 = vector.broadcast %cst_7 : f32 to vector<8x128xf32>
    %14 = arith.addf %13, %12 : vector<8x128xf32>
    %15 = arith.divf %13, %14 : vector<8x128xf32>
    %16 = arith.mulf %8, %15 : vector<8x128xf32>
    %c0_8 = arith.constant 0 : index
    %c0_9 = arith.constant 0 : index
    %17 = vector.load %arg19[%c0_8, %c0_9] : memref<8x32xf32, #tpu.memory_space<vmem>>, vector<8x32xf32>
    %18 = arith.truncf %16 : vector<8x128xf32> to vector<8x128xbf16>
    %c0_10 = arith.constant 0 : index
    %c0_11 = arith.constant 0 : index
    %19 = vector.load %arg13[%c0_10, %c0_11] : memref<128x32xbf16, #tpu.memory_space<vmem>>, vector<128x32xbf16>
    %cst_12 = arith.constant dense<0.000000e+00> : vector<8x32xf32>
    %20 = tpu.matmul %18, %19, %cst_12 {dimension_numbers = #tpu.dot_dimension_numbers<[1], [0], [0], [1], [0, 0, 1, 1], [], []>} : vector<8x128xbf16>, vector<128x32xbf16>, vector<8x32xf32> -> vector<8x32xf32>
    %21 = arith.addf %17, %20 : vector<8x32xf32>
    %c0_13 = arith.constant 0 : index
    %c0_14 = arith.constant 0 : index
    %22 = vector.load %arg19[%c0_13, %c0_14] : memref<8x32xf32, #tpu.memory_space<vmem>>, vector<8x32xf32>
    tpu.vector_store %arg19[%c0_13, %c0_14], %21 {strides = array<i32>} : memref<8x32xf32, #tpu.memory_space<vmem>>, vector<8x32xf32>,
    %c0_i32_15 = arith.constant 0 : i32
    %23 = arith.cmpi eq, %arg1, %c0_i32_15 : i32
    %24 = arith.extui %23 : i1 to i32
    %c0_i32_16 = arith.constant 0 : i32
    %25 = arith.cmpi ne, %24, %c0_i32_16 : i32
    scf.if %25 {
      %c0_17 = arith.constant 0 : index
      %c0_18 = arith.constant 0 : index
      %26 = vector.load %arg17[%c0_17, %c0_18] : memref<8x32xf32, #tpu.memory_space<vmem>>, vector<8x32xf32>
      %c0_19 = arith.constant 0 : index
      %c0_20 = arith.constant 0 : index
      %27 = vector.load %arg19[%c0_19, %c0_20] : memref<8x32xf32, #tpu.memory_space<vmem>>, vector<8x32xf32>
      %28 = arith.addf %26, %27 : vector<8x32xf32>
      %c0_21 = arith.constant 0 : index
      %c0_22 = arith.constant 0 : index
      %29 = vector.load %arg14[%c0_21, %c0_22] : memref<1x32xf32, #tpu.memory_space<vmem>>, vector<1x32xf32>
      %30 = vector.broadcast %29 : vector<1x32xf32> to vector<8x32xf32>
      %31 = arith.addf %28, %30 : vector<8x32xf32>
      %c0_23 = arith.constant 0 : index
      %c0_24 = arith.constant 0 : index
      %c0_25 = arith.constant 0 : index
      %32 = vector.load %arg15[%c0_23, %c0_24, %c0_25] : memref<1x8x32xf32, #tpu.memory_space<vmem>>, vector<1x8x32xf32>
      %33 = vector.shape_cast %32 : vector<1x8x32xf32> to vector<8x32xf32>
      %34 = vector.shape_cast %31 : vector<8x32xf32> to vector<1x8x32xf32>
      tpu.vector_store %arg15[%c0_23, %c0_24, %c0_25], %34 {strides = array<i32>} : memref<1x8x32xf32, #tpu.memory_space<vmem>>, vector<1x8x32xf32>,
    } else {
    }
    return
  }
  func.func @transform_0(%arg0: i32, %arg1: i32) -> (i32, i32, i32) {
    %c0_i32 = arith.constant 0 : i32
    %c0_i32_0 = arith.constant 0 : i32
    %c0_i32_1 = arith.constant 0 : i32
    return %arg0, %c0_i32, %c0_i32_0 : i32, i32, i32
  }
  func.func @transform_1(%arg0: i32, %arg1: i32) -> (i32, i32) {
    %c0_i32 = arith.constant 0 : i32
    %c0_i32_0 = arith.constant 0 : i32
    %c0_i32_1 = arith.constant 0 : i32
    return %c0_i32, %c0_i32_0 : i32, i32
  }
  func.func @transform_2(%arg0: i32, %arg1: i32) -> (i32, i32) {
    %c0_i32 = arith.constant 0 : i32
    %c0_i32_0 = arith.constant 0 : i32
    %c0_i32_1 = arith.constant 0 : i32
    return %c0_i32, %c0_i32_0 : i32, i32
  }
  func.func @transform_3(%arg0: i32, %arg1: i32) -> (i32, i32) {
    %c0_i32 = arith.constant 0 : i32
    %c0_i32_0 = arith.constant 0 : i32
    %c0_i32_1 = arith.constant 0 : i32
    return %c0_i32, %c0_i32_0 : i32, i32
  }
  func.func @transform_4(%arg0: i32, %arg1: i32) -> (i32, i32) {
    %c0_i32 = arith.constant 0 : i32
    %c0_i32_0 = arith.constant 0 : i32
    %c0_i32_1 = arith.constant 0 : i32
    return %c0_i32, %c0_i32_0 : i32, i32
  }
  func.func @transform_5(%arg0: i32, %arg1: i32) -> (i32, i32) {
    %c0_i32 = arith.constant 0 : i32
    %c0_i32_0 = arith.constant 0 : i32
    %c0_i32_1 = arith.constant 0 : i32
    return %c0_i32, %c0_i32_0 : i32, i32
  }
  func.func @transform_6(%arg0: i32, %arg1: i32) -> (i32, i32) {
    %c0_i32 = arith.constant 0 : i32
    %c0_i32_0 = arith.constant 0 : i32
    %c0_i32_1 = arith.constant 0 : i32
    return %c0_i32, %c0_i32_0 : i32, i32
  }
  func.func @transform_7(%arg0: i32, %arg1: i32) -> (i32, i32) {
    %c0_i32 = arith.constant 0 : i32
    %c0_i32_0 = arith.constant 0 : i32
    %c0_i32_1 = arith.constant 0 : i32
    return %c0_i32, %c0_i32_0 : i32, i32
  }
  func.func @transform_8(%arg0: i32, %arg1: i32) -> (i32, i32) {
    %c0_i32 = arith.constant 0 : i32
    %c0_i32_0 = arith.constant 0 : i32
    %c0_i32_1 = arith.constant 0 : i32
    return %c0_i32, %c0_i32_0 : i32, i32
  }
  func.func @transform_9(%arg0: i32, %arg1: i32) -> (i32, i32) {
    %c0_i32 = arith.constant 0 : i32
    %c0_i32_0 = arith.constant 0 : i32
    return %c0_i32, %arg1 : i32, i32
  }
  func.func @transform_10(%arg0: i32, %arg1: i32) -> (i32, i32) {
    %c0_i32 = arith.constant 0 : i32
    %c0_i32_0 = arith.constant 0 : i32
    return %c0_i32, %arg1 : i32, i32
  }
  func.func @transform_11(%arg0: i32, %arg1: i32) -> (i32, i32) {
    %c0_i32 = arith.constant 0 : i32
    %c0_i32_0 = arith.constant 0 : i32
    return %arg1, %c0_i32 : i32, i32
  }
  func.func @transform_12(%arg0: i32, %arg1: i32) -> (i32, i32) {
    %c0_i32 = arith.constant 0 : i32
    %c0_i32_0 = arith.constant 0 : i32
    %c0_i32_1 = arith.constant 0 : i32
    return %c0_i32, %c0_i32_0 : i32, i32
  }
  func.func @transform_13(%arg0: i32, %arg1: i32) -> (i32, i32, i32) {
    %c0_i32 = arith.constant 0 : i32
    %c0_i32_0 = arith.constant 0 : i32
    %c0_i32_1 = arith.constant 0 : i32
    return %arg0, %c0_i32, %c0_i32_0 : i32, i32, i32
  }
}

</mosaic_0001>

<bundles_post_ra>
// kernel: tpu_custom_call.1
= control target key start
LH: loop header
LB: loop body
LE: loop exit
PB: predicated region body
PF: predicated region fallthrough
CT: control target
= control target key end

     0   :  { %s2236_s0 = inlined_call_operand.vmem [shape: f32[2,8,32], index: 0, kind: input, shape index: {}]   ;;  %s2237_s1 = inlined_call_operand.vmem [shape: f32[1,32], index: 1, kind: input, shape index: {}]   ;;  %s2238_s2 = inlined_call_operand.vmem [shape: f32[1,32], index: 2, kind: input, shape index: {}]   ;;  %s2239_s3 = inlined_call_operand.vmem [shape: bf16[32,96], index: 3, kind: input, shape index: {}]   ;;  %s2240_s4 = inlined_call_operand.vmem [shape: f32[1,96], index: 4, kind: input, shape index: {}]   ;;  %s2241_s5 = inlined_call_operand.vmem [shape: bf16[32,32], index: 5, kind: input, shape index: {}]   ;;  %s2242_s6 = inlined_call_operand.vmem [shape: f32[1,32], index: 6, kind: input, shape index: {}]   ;;  %s2243_s7 = inlined_call_operand.vmem [shape: f32[1,32], index: 7, kind: input, shape index: {}]   ;;  %s2244_s8 = inlined_call_operand.vmem [shape: f32[1,32], index: 8, kind: input, shape index: {}]   ;;  %s2245_s9 = inlined_call_operand.vmem [shape: bf16[32,128], index: 9, kind: input, shape index: {}]   ;;  %s2246_s10 = inlined_call_operand.vmem [shape: f32[1,128], index: 10, kind: input, shape index: {}]   ;;  %s2247_s11 = inlined_call_operand.vmem [shape: bf16[128,32], index: 11, kind: input, shape index: {}]   ;;  %s2248_s12 = inlined_call_operand.vmem [shape: f32[1,32], index: 12, kind: input, shape index: {}]   ;;  %s2249_s13 = inlined_call_operand.hbm [shape: f32[2,8,32], index: 13, kind: output, shape index: {}]  }
   0x1   :  { %2250 = sst [smem:[#allocation9_spill]] %s2236_s0 }
   0x2   :  { %2251 = sst [smem:[#allocation10_spill]] %s2237_s1 }
   0x3   :  { %2252 = sst [smem:[#allocation11_spill]] %s2238_s2 }
   0x4   :  { %2253 = sst [smem:[#allocation12_spill]] %s2239_s3 }
   0x5   :  { %18 = vsyncpa [#allocation7], 0 }
   0x6   :  { %20 = vsyncpa [#allocation7 + $0x1], 0  ;;  %s1957_s25 = smov 0   ;;  %s1959_s26 = smov 0  }
   0x7   :  { %s1961_s27 = smov 0   ;;  %s1963_s28 = smov 0  }
   0x8   :  { %s1965_s29 = smov 0   ;;  %s1967_s30 = smov 0  }
   0x9 LB: > { %s1501_s14 = sadd.s32 4294967295, %s1868_s30   ;;  %s1502_s15 = sadd.s32 4294967294, %s1868_s30   ;;  %s1868_s30 = sphi %s1967_s30, %s26_s30   ;;  %s1864_s29 = sphi %s1965_s29, %s2264_s29   ;;  %s1860_s28 = sphi %s1963_s28, %s2263_s28   ;;  %s1856_s27 = sphi %s1961_s27, %s2262_s27   ;;  %s1852_s26 = sphi %s1959_s26, %s2261_s26   ;;  %s1848_s25 = sphi %s1957_s25, %s2260_s25  }
   0xa   : > { %s38_s16 = sadd.s32 1, %s1864_s29  ;;  %s338_s17 = sadd.s32 1, %s1856_s27 }
   0xb   : > { %p40_p0 = scmp.ge.s32.totalorder %s38_s16, 2  ;;  %p348_p1 = scmp.ne.s32.totalorder %s1856_s27, %s1852_s26 }
   0xc   : > { %p349_p2 = scmp.eq.s32.totalorder %s1501_s14, 1  ;;  %p354_p3 = scmp.ne.s32.totalorder %s1852_s26, %s1848_s25 }
   0xd   : > { %s2266_s16 = smov (%p40_p0, %s38_s16), 0  ;;  %p355_p5 = scmp.eq.s32.totalorder %s1502_s15, 1 }
   0xe   : > { %p1997_p4 = por %p349_p2, %p348_p1  ;;  %s335_s19 = ssub.s32 %s1864_s29, %s2266_s16 }
   0xf   : > { %p1508_p6 = scmp.ge.s32.totalorder %s1868_s30, 1  ;;  %p336_p7 = scmp.eq.s32.totalorder %s335_s19, 0 }
  0x10   : > { %p2004_p8 = por %p355_p5, %p354_p3  ;;  %p429_p9 = scmp.lt.s32.totalorder %s1868_s30, 3 }
  0x11   : > { %s2010_s21 = scalar_select %p336_p7, %s1856_s27, %s338_s17  }
  0x12   : > { %p430_p10 = pnand %p1508_p6, %p429_p9 }
  0x13   : > { %p484_p11 = scmp.lt.s32.totalorder (!%p430_p10), %s1860_s28, 1  ;;  %vm509_vm0 = vcmask (!%p430_p10), 261120   ;;  %s2256_s0 = sld [smem:[#allocation9_spill]] (!%p430_p10)  ;;  %v1870_v8 = vmov (!%p430_p10), 0.0   ;;  %vm1871_vm1 = vmmov (!%p430_p10), 0   ;;  %vm609_vm2 = vcmask (!%p430_p10), 64512  }
  0x14   : > { %433 = sbr.rel (%p430_p10) target bundleno = 2637 (0xa4d), region = 72  ;;  %s2257_s3 = sld [smem:[#allocation12_spill]] (!%p430_p10)  ;;  %1589 = vmatprep.subr.bf16.mxu0 (!%p430_p10), %v1870_v8  ;;  %1178 = vst.msk [vmem:[#allocation5] sm:$0xff] (!%p430_p10), %vm509_vm0, %v1870_v8  ;;  %1593 = vmatprep.mubr.msk.bf16.mxu0 (!%p430_p10), %vm1871_vm1, %v1870_v8  ;;  %v1513_v20 = vld [vmem:[%s2240_s4] ss:$0 sm:$0xff] (!%p430_p10)  ;;  %vm673_vm3 = vcmask (!%p430_p10), 1043456  }
  0x15   : > { %1609 = vmatprep.subr.bf16.mxu1 (!%p430_p10), %v1870_v8  ;;  %1611 = vmatprep.mubr.msk.bf16.mxu1 (!%p430_p10), %vm1871_vm1, %v1870_v8  ;;  %s2258_s1 = sld [smem:[#allocation10_spill]] (!%p430_p10)  ;;  %s2259_s2 = sld [smem:[#allocation11_spill]] (!%p430_p10)  ;;  %vm718_vm4 = vcmask (!%p430_p10), 60416   ;;  %vm837_vm5 = vcmask (!%p430_p10), 126016   ;;  %vm956_vm6 = vcmask (!%p430_p10), 191616   ;;  %vm1075_vm7 = vcmask (!%p430_p10), 257216  }
  0x16   : > { %s1873_s24 = smov (!%p430_p10), 96   ;;  %s1874_s14 = smov (!%p430_p10), 88   ;;  %vm1176_vm8 = vcmask (!%p430_p10), 257024  }
  0x17   : > { %s1876_s17 = smov (!%p430_p10), 112   ;;  %s1877_s19 = smov (!%p430_p10), 72  }
  0x1a   : > { %v1752_v7 = vld [vmem:[%s2257_s3] sm:$0xff] (!%p430_p10)   ;;  %v1753_v9 = vld [vmem:[%s2257_s3 + $0x8] sm:$0xff] (!%p430_p10)  }
  0x1b   : > { %s485_s22 = scalar_select %p484_p11, %s1860_s28, 1  ;;  %1590 = vmatpush3.bf16.msra.mxu0 %v1752_v7  ;;  %v1511_v14 = vld [vmem:[%s2258_s1] ss:$0 sm:$0xff] }
  0x1c   : > { %1591 = vmatprep.subr.bf16.mxu0 %v1870_v8  ;;  %v1512_v16 = vld [vmem:[%s2259_s2] ss:$0 sm:$0xff] }
  0x1d   : > { %s1510_s23 = sshll.u32 %s485_s22, 3  ;;  %s1878_s22 = smov 104  }
  0x1e   : > { %s487_s15 = scalar_lea.vmem %s2256_s0, %s1510_s23  ;;  %s1872_s23 = smov 120  }
  0x1f   : > { %v2017_v0 = vld [vmem:[%s487_s15] sm:$0xff]  ;;  %1592 = vmatpush3.bf16.msra.mxu0 %v1753_v9  ;;  %s1875_s15 = smov 80   ;;  %s481_s0 = sand.u32 1, %s1852_s26  }
  0x20   : > { %v510_v1 = vsel %vm509_vm0, %v2017_v0, 0.0  ;;  %1597 = vmatprep.subr.bf16.mxu0 %v1870_v8  ;;  %s1379_s3 = scalar_lea.sflag [#allocation7], %s481_s0 }
  0x21   : > { %511 = vadd.xlane.f32.xlu0 %v510_v1 }
  0xae   : > { %v512_v2 = vpop.xlane.xlu0 %511 }
  0xaf   : > { %v514_v3 = vmul.f32 0.03125, %v512_v2 }
  0xb1   : > { %v515_v4 = vsub.f32 %v2017_v0, %v514_v3 }
  0xb3   : > { %v516_v5 = vmul.f32 %v515_v4, %v515_v4 }
  0xb5   : > { %v517_v6 = vsel %vm509_vm0, %v516_v5, 0.0 }
  0xb6   : > { %518 = vadd.xlane.f32.xlu0 %v517_v6 }
 0x143   : > { %v519_v10 = vpop.xlane.xlu0 %518 }
 0x144   : > { %v520_v11 = vmul.f32 0.03125, %v519_v10 }
 0x146   : > { %v521_v12 = vadd.f32 1e-05, %v520_v11 }
 0x148   : > { %1766 = vrsqrt.f32 %v521_v12 }
 0x152   : > { %v1767_v13 = vpop.eup %1766 }
 0x153   : > { %v523_v15 = vmul.f32 %v1767_v13, %v515_v4 }
 0x155   : > { %v530_v17 = vmul.f32 %v1511_v14, %v523_v15 }
 0x157   : > { %v537_v18 = vadd.f32 %v1512_v16, %v530_v17 }
 0x159   : > { %v538_v19 = vpack.c.bf16 %v537_v18, %v537_v18 }
 0x15b   : > { %1594 = vmatmul.mubr.msk.bf16.vlgmr.msra.gmra.mrb[0].mxu0 %vm509_vm0, %v538_v19 }
 0x15c   : > { %1599 = vmatprep.mubr.msk.bf16.mxu0 %vm1871_vm1, %v1870_v8 }
 0x22e   : > { %v599_v21 = vpop.f32.mrb[0].mxu0 }
 0x22f   : > { %v600_v22 = vadd.f32 %v1513_v20, %v599_v21  ;;  %v1595_v23 = vpop.f32.mrb[1].mxu0 }
 0x230   : > { %v602_v24 = vpop.f32.mrb[2].mxu0 }
 0x231   : > { %v2051_v25 = vpack.c.bf16 %v600_v22, %v600_v22  ;;  %v1596_v26 = vpop.f32.mrb[3].mxu0 }
 0x233   : > { %720 = vrot.lane.b32.xlu0 %v2051_v25, %s1872_s23  ;;  %607 = vrot.lane.b32.xlu1 %v2051_v25, %s1873_s24  ;;  %s1879_s23 = smov 64   ;;  %s1880_s24 = smov 56  }
 0x237   : > { %722 = vrot.lane.b32.xlu1 %v2051_v25, %s1874_s14  ;;  %s1881_s14 = smov 48  }
 0x23b   : > { %841 = vrot.lane.b32.xlu1 %v2051_v25, %s1875_s15  ;;  %s1882_s15 = smov 40  }
 0x23f   : > { %839 = vrot.lane.b32.xlu1 %v2051_v25, %s1876_s17  ;;  %s1883_s17 = smov 8  }
 0x243   : > { %960 = vrot.lane.b32.xlu1 %v2051_v25, %s1877_s19 }
 0x247   : > { %958 = vrot.lane.b32.xlu1 %v2051_v25, %s1878_s22  ;;  %s1549_s22 = sshll.u32 %s1860_s28, 7  ;;  %s1886_s28 = smov [#allocation6]  }
 0x248   : > { %s2188_s2 = scalar_lea.hbm %s2249_s13, %s1549_s22 }
 0x2a5   : > { %v608_v27 = vpop.permute.xlu1 %607  ;;  %v721_v32 = vpop.permute.xlu0 %720 }
 0x2a6   : > { %v614_v28 = vsel %vm609_vm2, %v608_v27, 0 }
 0x2a7   : > { %1598 = vmatpush3.bf16.xpose.msra.mxu0 %v614_v28 }
 0x2a8   : > { %1603 = vmatprep.subr.bf16.mxu0 %v1870_v8 }
 0x2a9   : > { %v723_v29 = vpop.permute.xlu1 %722 }
 0x2aa   : > { %v728_v30 = vsel %vm609_vm2, %v723_v29, 0 }
 0x2ab   : > { %1610 = vmatpush3.bf16.xpose.msra.mxu1 %v728_v30 }
 0x2ac   : > { %1621 = vmatprep.subr.bf16.mxu1 %v1870_v8 }
 0x2ad   : > { %v842_v31 = vpop.permute.xlu1 %841 }
 0x2ae   : > { %1600 = vmatmul.mubr.msk.bf16.vlgmr.msra.gmra.mrb[4].mxu0 %vm609_vm2, %v2051_v25  ;;  %v847_v34 = vsel %vm609_vm2, %v842_v31, 0 }
 0x2af   : > { %1605 = vmatprep.mubr.msk.bf16.mxu0 %vm1871_vm1, %v1870_v8 }
 0x2b1   : > { %v840_v33 = vpop.permute.xlu1 %839 }
 0x2b2   : > { %1612 = vmatmul.mubr.msk.bf16.vlgmr.msra.gmra.mrb[0].mxu1 %vm609_vm2, %v721_v32 }
 0x2b3   : > { %1622 = vmatpush3.bf16.xpose.msra.mxu1 %v847_v34  ;;  %1623 = vmatprep.mubr.msk.bf16.mxu1 %vm1871_vm1, %v1870_v8 }
 0x2b4   : > { %1633 = vmatprep.subr.bf16.mxu1 %v1870_v8 }
 0x2b5   : > { %v961_v35 = vpop.permute.xlu1 %960 }
 0x2b6   : > { %v966_v36 = vsel %vm609_vm2, %v961_v35, 0 }
 0x2b9   : > { %v959_v37 = vpop.permute.xlu1 %958 }
 0x2ba   : > { %1624 = vmatmul.mubr.msk.bf16.vlgmr.msra.gmra.mrb[4].mxu1 %vm609_vm2, %v840_v33 }
 0x2bb   : > { %1634 = vmatpush3.bf16.xpose.msra.mxu1 %v966_v36  ;;  %1635 = vmatprep.mubr.msk.bf16.mxu1 %vm1871_vm1, %v1870_v8 }
 0x2bc   : > { %1645 = vmatprep.subr.bf16.mxu1 %v1870_v8 }
 0x2c2   : > { %1636 = vmatmul.mubr.msk.bf16.vlgmr.msra.gmra.mrb[8].mxu1 %vm609_vm2, %v959_v37 }
 0x2c3   : > { %1649 = vmatprep.mubr.msk.bf16.mxu1 %vm1871_vm1, %v1870_v8 }
 0x381   : > { %v650_v38 = vpop.f32.mrb[4].mxu0 }
 0x382   : > { %v1601_v39 = vpop.f32.mrb[5].mxu0  ;;  %v656_v40 = vsel %vm609_vm2, %v650_v38, -inf }
 0x383   : > { %657 = vmax.xlane.f32.xlu1 %v656_v40  ;;  %v653_v41 = vpop.f32.mrb[6].mxu0 }
 0x384   : > { %v1602_v42 = vpop.f32.mrb[7].mxu0 }
 0x385   : > { %v764_v43 = vpop.f32.mrb[0].mxu1 }
 0x386   : > { %v1613_v44 = vpop.f32.mrb[1].mxu1  ;;  %v770_v45 = vsel %vm609_vm2, %v764_v43, -inf }
 0x387   : > { %771 = vmax.xlane.f32.xlu0 %v770_v45  ;;  %v767_v46 = vpop.f32.mrb[2].mxu1 }
 0x388   : > { %v1614_v47 = vpop.f32.mrb[3].mxu1 }
 0x38d   : > { %v883_v48 = vpop.f32.mrb[4].mxu1 }
 0x38e   : > { %v1625_v49 = vpop.f32.mrb[5].mxu1  ;;  %v889_v50 = vsel %vm609_vm2, %v883_v48, -inf }
 0x38f   : > { %v886_v51 = vpop.f32.mrb[6].mxu1  ;;  %890 = vmax.xlane.f32.xlu1 %v889_v50  ;;  %v1754_v50 = vld [vmem:[%s2241_s5] sm:$0xff]  }
 0x390   : > { %v1626_v52 = vpop.f32.mrb[7].mxu1  ;;  %1646 = vmatpush3.bf16.msra.mxu1 %v1754_v50 }
 0x391   : > { %v1755_v52 = vld [vmem:[%s2241_s5 + $0x8] sm:$0xff]   ;;  %1647 = vmatprep.subr.bf16.mxu1 %v1870_v8 }
 0x394   : > { %1648 = vmatpush3.bf16.msra.mxu1 %v1755_v52 }
 0x395   : > { %v1002_v53 = vpop.f32.mrb[8].mxu1  ;;  %1661 = vmatprep.subr.bf16.mxu1 %v1870_v8 }
 0x396   : > { %v1637_v54 = vpop.f32.mrb[9].mxu1  ;;  %v1008_v55 = vsel %vm609_vm2, %v1002_v53, -inf }
 0x397   : > { %1009 = vmax.xlane.f32.xlu0 %v1008_v55  ;;  %v1005_v56 = vpop.f32.mrb[10].mxu1 }
 0x398   : > { %v1638_v57 = vpop.f32.mrb[11].mxu1 }
 0x410   : > { %v658_v58 = vpop.xlane.xlu1 %657 }
 0x411   : > { %v659_v59 = vsub.f32 %v650_v38, %v658_v58 }
 0x413   : > { %v660_v60 = vmul.f32 1.442695, %v659_v59 }
 0x414   : > { %v772_v61 = vpop.xlane.xlu0 %771 }
 0x415   : > { %1768 = vpow2.f32 %v660_v60  ;;  %v773_v62 = vsub.f32 %v764_v43, %v772_v61 }
 0x417   : > { %v774_v63 = vmul.f32 1.442695, %v773_v62 }
 0x419   : > { %1770 = vpow2.f32 %v774_v63 }
 0x41c   : > { %v891_v11 = vpop.xlane.xlu1 %890 }
 0x41d   : > { %v892_v12 = vsub.f32 %v883_v48, %v891_v11 }
 0x41f   : > { %v1769_v1 = vpop.eup %1768  ;;  %v893_v13 = vmul.f32 1.442695, %v892_v12 }
 0x420   : > { %v662_v2 = vsel %vm609_vm2, %v1769_v1, 0.0 }
 0x421   : > { %663 = vadd.xlane.f32.xlu1 %v662_v2 }
 0x423   : > { %v1771_v3 = vpop.eup %1770 }
 0x424   : > { %v1010_v4 = vpop.xlane.xlu0 %1009  ;;  %v776_v5 = vsel %vm609_vm2, %v1771_v3, 0.0 }
 0x425   : > { %v1011_v6 = vsub.f32 %v1002_v53, %v1010_v4  ;;  %777 = vadd.xlane.f32.xlu0 %v776_v5 }
 0x427   : > { %v1012_v7 = vmul.f32 1.442695, %v1011_v6 }
 0x429   : > { %1772 = vpow2.f32 %v1012_v7 }
 0x42a   : > { %1774 = vpow2.f32 %v893_v13 }
 0x432   : > { %668 = vrot.lane.b32.xlu1 %v2051_v25, %s1879_s23 }
 0x433   : > { %v1773_v9 = vpop.eup %1772 }
 0x434   : > { %v1014_v10 = vsel %vm609_vm2, %v1773_v9, 0.0  ;;  %v1775_v14 = vpop.eup %1774 }
 0x435   : > { %1015 = vadd.xlane.f32.xlu0 %v1014_v10  ;;  %v895_v15 = vsel %vm609_vm2, %v1775_v14, 0.0 }
 0x44b   : > { %782 = vrot.lane.b32.xlu0 %v2051_v25, %s1880_s24 }
 0x456   : > { %896 = vadd.xlane.f32.xlu1 %v895_v15 }
 0x467   : > { %901 = vrot.lane.b32.xlu1 %v2051_v25, %s1881_s14  ;;  %s1884_s14 = smov 16  }
 0x46b   : > { %1020 = vrot.lane.b32.xlu1 %v2051_v25, %s1882_s15  ;;  %s1885_s15 = smov 24  }
 0x4ae   : > { %v664_v16 = vpop.xlane.xlu1 %663 }
 0x4af   : > { %1776 = vrcp.f32 %v664_v16 }
 0x4b2   : > { %v669_v17 = vpop.permute.xlu1 %668  ;;  %v778_v19 = vpop.xlane.xlu0 %777 }
 0x4b3   : > { %v675_v18 = vsel %vm673_vm3, %v669_v17, 0  ;;  %1778 = vrcp.f32 %v778_v19  ;;  %v1756_v17 = vld [vmem:[%s2245_s9] sm:$0xff]  }
 0x4b4   : > { %1604 = vmatpush3.bf16.msra.mxu0 %v675_v18 }
 0x4b5   : > { %1615 = vmatprep.subr.bf16.mxu0 %v1870_v8 }
 0x4b9   : > { %v1777_v20 = vpop.eup %1776 }
 0x4ba   : > { %v666_v21 = vmul.f32 %v1777_v20, %v1769_v1 }
 0x4bc   : > { %v667_v22 = vpack.c.bf16 %v666_v21, %v666_v21 }
 0x4bd   : > { %v1779_v23 = vpop.eup %1778 }
 0x4be   : > { %1606 = vmatmul.mubr.msk.bf16.vlgmr.msra.gmra.mrb[8].mxu0 %vm609_vm2, %v667_v22  ;;  %v780_v25 = vmul.f32 %v1779_v23, %v1771_v3  ;;  %v1528_v3 = vld [vmem:[%s2242_s6] ss:$0 sm:$0xff] }
 0x4bf   : > { %1617 = vmatprep.mubr.msk.bf16.mxu0 %vm1871_vm1, %v1870_v8  ;;  %v1532_v22 = vld [vmem:[%s2243_s7] ss:$0 sm:$0xff] }
 0x4c0   : > { %v781_v28 = vpack.c.bf16 %v780_v25, %v780_v25 }
 0x4c2   : > { %v1016_v24 = vpop.xlane.xlu0 %1015 }
 0x4c6   : > { %v783_v26 = vpop.permute.xlu0 %782 }
 0x4c7   : > { %v788_v27 = vsel %vm673_vm3, %v783_v26, 0 }
 0x4c8   : > { %1616 = vmatpush3.bf16.msra.mxu0 %v788_v27 }
 0x4c9   : > { %1627 = vmatprep.subr.bf16.mxu0 %v1870_v8 }
 0x4cb   : > { %1618 = vmatmul.mubr.msk.bf16.vlgmr.msra.gmra.mrb[12].mxu0 %vm609_vm2, %v781_v28 }
 0x4cc   : > { %1629 = vmatprep.mubr.msk.bf16.mxu0 %vm1871_vm1, %v1870_v8 }
 0x4e3   : > { %v897_v29 = vpop.xlane.xlu1 %896 }
 0x4e4   : > { %1780 = vrcp.f32 %v897_v29  ;;  %v1758_v29 = vld [vmem:[%s2247_s11] sm:$0xff]  }
 0x4e5   : > { %1782 = vrcp.f32 %v1016_v24  ;;  %v1533_v24 = vld [vmem:[%s2244_s8] ss:$0 sm:$0xff] }
 0x4e7   : > { %v902_v30 = vpop.permute.xlu1 %901 }
 0x4e8   : > { %v907_v31 = vsel %vm673_vm3, %v902_v30, 0  ;;  %v1759_v30 = vld [vmem:[%s2247_s11 + $0x8] sm:$0xff]  }
 0x4e9   : > { %1628 = vmatpush3.bf16.msra.mxu0 %v907_v31  ;;  %v1760_v31 = vld [vmem:[%s2247_s11 + $0x10] sm:$0xff]  }
 0x4ea   : > { %1639 = vmatprep.subr.bf16.mxu0 %v1870_v8 }
 0x4eb   : > { %v1021_v34 = vpop.permute.xlu1 %1020 }
 0x4ec   : > { %v1026_v37 = vsel %vm673_vm3, %v1021_v34, 0  ;;  %v1763_v34 = vld [vmem:[%s2247_s11 + $0x28] sm:$0xff]  }
 0x4ee   : > { %v1781_v32 = vpop.eup %1780 }
 0x4ef   : > { %v899_v33 = vmul.f32 %v1781_v32, %v1775_v14  ;;  %v1783_v36 = vpop.eup %1782  ;;  %v1761_v32 = vld [vmem:[%s2247_s11 + $0x18] sm:$0xff]  }
 0x4f0   : > { %v1018_v38 = vmul.f32 %v1783_v36, %v1773_v9  ;;  %v1765_v36 = vld [vmem:[%s2247_s11 + $0x38] sm:$0xff]  }
 0x4f1   : > { %v900_v35 = vpack.c.bf16 %v899_v33, %v899_v33  ;;  %v1762_v33 = vld [vmem:[%s2247_s11 + $0x20] sm:$0xff]  }
 0x4f2   : > { %v1019_v39 = vpack.c.bf16 %v1018_v38, %v1018_v38 }
 0x4f3   : > { %1630 = vmatmul.mubr.msk.bf16.vlgmr.msra.gmra.mrb[16].mxu0 %vm609_vm2, %v900_v35  ;;  %v1764_v35 = vld [vmem:[%s2247_s11 + $0x30] sm:$0xff]  }
 0x4f4   : > { %1640 = vmatpush3.bf16.msra.mxu0 %v1026_v37  ;;  %1641 = vmatprep.mubr.msk.bf16.mxu0 %vm1871_vm1, %v1870_v8  ;;  %v1534_v37 = vld [vmem:[%s2246_s10] ss:$0 sm:$0xff] }
 0x4f5   : > { %1653 = vmatprep.subr.bf16.mxu0 %v1870_v8 }
 0x4fb   : > { %1642 = vmatmul.mubr.msk.bf16.vlgmr.msra.gmra.mrb[20].mxu0 %vm609_vm2, %v1019_v39 }
 0x4fc   : > { %1657 = vmatprep.mubr.msk.bf16.mxu0 %vm1871_vm1, %v1870_v8  ;;  %1654 = vmatpush3.bf16.msra.mxu0 %v1756_v17 }
 0x4fd   : > { %1655 = vmatprep.subr.bf16.mxu0 %v1870_v8 }
 0x591   : > { %v711_v40 = vpop.f32.mrb[8].mxu0 }
 0x592   : > { %v717_v41 = vpack.c.bf16 %v711_v40, %v711_v40  ;;  %v1607_v42 = vpop.f32.mrb[9].mxu0 }
 0x593   : > { %v714_v43 = vpop.f32.mrb[10].mxu0 }
 0x594   : > { %719 = vst.msk [vmem:[#allocation2] sm:$0xf] %vm718_vm4, %v717_v41  ;;  %v1608_v44 = vpop.f32.mrb[11].mxu0 }
 0x59e   : > { %v824_v45 = vpop.f32.mrb[12].mxu0 }
 0x59f   : > { %v1552_v46 = vpack.c.bf16 %v824_v45, %v824_v45  ;;  %v1619_v47 = vpop.f32.mrb[13].mxu0 }
 0x5a0   : > { %v827_v48 = vpop.f32.mrb[14].mxu0 }
 0x5a1   : > { %834 = vrot.lane.b32.xlu0 %v1552_v46, %s1883_s17  ;;  %v1620_v49 = vpop.f32.mrb[15].mxu0 }
 0x5a2   : > { %v1255_v49 = vld [vmem:[#allocation5] sm:$0xff] }
 0x5c6   : > { %v943_v51 = vpop.f32.mrb[16].mxu0 }
 0x5c7   : > { %v1553_v53 = vpack.c.bf16 %v943_v51, %v943_v51  ;;  %v1631_v54 = vpop.f32.mrb[17].mxu0 }
 0x5c8   : > { %v946_v55 = vpop.f32.mrb[18].mxu0 }
 0x5c9   : > { %953 = vrot.lane.b32.xlu1 %v1553_v53, %s1884_s14  ;;  %v1632_v56 = vpop.f32.mrb[19].mxu0 }
 0x5ce   : > { %v1062_v57 = vpop.f32.mrb[20].mxu0 }
 0x5cf   : > { %v1554_v58 = vpack.c.bf16 %v1062_v57, %v1062_v57  ;;  %v1643_v59 = vpop.f32.mrb[21].mxu0  ;;  %v1547_v57 = vld [vmem:[%s2248_s12] ss:$0 sm:$0xff] }
 0x5d0   : > { %v1065_v60 = vpop.f32.mrb[22].mxu0 }
 0x5d1   : > { %1072 = vrot.lane.b32.xlu0 %v1554_v58, %s1885_s15  ;;  %v1644_v61 = vpop.f32.mrb[23].mxu0  ;;  %s1509_s15 = sshll.u32 %s481_s0, 3 }
 0x5d2   : > { %s483_s23 = scalar_lea.vmem [#allocation6], %s1509_s15  ;;  %s1794_s15 = sshll.u32 %s1886_s28, 4  ;;  %s1795_s15 = int_to_ptr.vmem [resolvable:$false] %s1794_s15 }
 0x5d3   : > { %s1392_s24 = sshll.u32 %s483_s23, 4  ;;  %s1796_s19 = scalar_lea.vmem %s1795_s15, 256  ;;  %s2190_s24 = int_to_ptr.vmem [resolvable:$true] %s1392_s24 }
 0x5d4   : > { %s1790_s17 = scalar_lea.vmem %s2190_s24, 128  ;;  %p1797_p1 = scmp.lt.s32.totalorder %s2190_s24, %s1795_s15 }
 0x5d5   : > { %p1791_p12 = scmp.ne.s32.totalorder %s2190_s24, %s1790_s17  ;;  %p1798_p2 = scmp.lt.s32.totalorder %s1796_s19, %s1790_s17 }
 0x5d7   : > { %p1792_p13 = pnand %p1791_p12, %p1997_p4  ;;  %p1799_p3 = por %p1798_p2, %p1797_p1 }
 0x5d9   : > { %p1793_p0 = pneg %p1792_p13 }
 0x5db   : > { %p1800_p5 = pnand %p1799_p3, %p1793_p0 }
 0x613   : > { %v835_v62 = vpop.permute.xlu0 %834 }
 0x614   : > { %838 = vst.msk [vmem:[#allocation2] sm:$0xf] %vm837_vm5, %v835_v62 }
 0x63b   : > { %v954_v63 = vpop.permute.xlu1 %953 }
 0x63c   : > { %957 = vst.msk [vmem:[#allocation2] sm:$0xf] %vm956_vm6, %v954_v63 }
 0x643   : > { %v1073_v1 = vpop.permute.xlu0 %1072 }
 0x644   : > { %1076 = vst.msk [vmem:[#allocation2] sm:$0xf] %vm1075_vm7, %v1073_v1 }
 0x64b   : > { %v1077_v2 = vld [vmem:[#allocation2] sm:$0xf] }
 0x64c   : > { %1650 = vmatmul.mubr.msk.bf16.vlgmr.msra.gmra.mrb[12].mxu1 %vm509_vm0, %v1077_v2 }
 0x64d   : > { %1677 = vmatprep.mubr.msk.bf16.mxu1 %vm1871_vm1, %v1870_v8  ;;  %1662 = vmatpush3.bf16.msra.mxu1 %v1758_v29 }
 0x64e   : > { %1663 = vmatprep.subr.bf16.mxu1 %v1870_v8 }
 0x651   : > { %1664 = vmatpush3.bf16.msra.mxu1 %v1759_v30 }
 0x652   : > { %1665 = vmatprep.subr.bf16.mxu1 %v1870_v8 }
 0x655   : > { %1666 = vmatpush3.bf16.msra.mxu1 %v1760_v31 }
 0x656   : > { %1667 = vmatprep.subr.bf16.mxu1 %v1870_v8 }
 0x659   : > { %1668 = vmatpush3.bf16.msra.mxu1 %v1761_v32 }
 0x65a   : > { %1669 = vmatprep.subr.bf16.mxu1 %v1870_v8 }
 0x65d   : > { %1670 = vmatpush3.bf16.msra.mxu1 %v1762_v33 }
 0x65e   : > { %1671 = vmatprep.subr.bf16.mxu1 %v1870_v8 }
 0x661   : > { %1672 = vmatpush3.bf16.msra.mxu1 %v1763_v34 }
 0x662   : > { %1673 = vmatprep.subr.bf16.mxu1 %v1870_v8 }
 0x665   : > { %1674 = vmatpush3.bf16.msra.mxu1 %v1764_v35 }
 0x666   : > { %1675 = vmatprep.subr.bf16.mxu1 %v1870_v8 }
 0x669   : > { %1676 = vmatpush3.bf16.msra.mxu1 %v1765_v36 }
 0x71f   : > { %v1138_v4 = vpop.f32.mrb[12].mxu1 }
 0x720   : > { %v1139_v5 = vadd.f32 %v1528_v3, %v1138_v4  ;;  %v1651_v6 = vpop.f32.mrb[13].mxu1 }
 0x721   : > { %v1141_v7 = vpop.f32.mrb[14].mxu1 }
 0x722   : > { %v1144_v9 = vadd.f32 %v1139_v5, %v2017_v0  ;;  %v1652_v10 = vpop.f32.mrb[15].mxu1  ;;  %v1757_v0 = vld [vmem:[%s2245_s9 + $0x8] sm:$0xff]  }
 0x723   : > { %1656 = vmatpush3.bf16.msra.mxu0 %v1757_v0 }
 0x724   : > { %1145 = vst.msk [vmem:[#allocation3] sm:$0xff] %vm509_vm0, %v1144_v9  ;;  %v1148_v11 = vsel %vm509_vm0, %v1144_v9, 0.0 }
 0x725   : > { %1149 = vadd.xlane.f32.xlu1 %v1148_v11 }
 0x72b   : > { %v1366_v55 = vld [vmem:[#allocation3] sm:$0xff] }
 0x7b2   : > { %v1150_v12 = vpop.xlane.xlu1 %1149 }
 0x7b3   : > { %v1151_v13 = vmul.f32 0.03125, %v1150_v12 }
 0x7b5   : > { %v1152_v14 = vsub.f32 %v1144_v9, %v1151_v13 }
 0x7b7   : > { %v1153_v15 = vmul.f32 %v1152_v14, %v1152_v14 }
 0x7b9   : > { %v1154_v16 = vsel %vm509_vm0, %v1153_v15, 0.0 }
 0x7ba   : > { %1155 = vadd.xlane.f32.xlu0 %v1154_v16 }
 0x847   : > { %v1156_v18 = vpop.xlane.xlu0 %1155 }
 0x848   : > { %v1157_v19 = vmul.f32 0.03125, %v1156_v18 }
 0x84a   : > { %v1158_v20 = vadd.f32 1e-05, %v1157_v19 }
 0x84c   : > { %1784 = vrsqrt.f32 %v1158_v20 }
 0x856   : > { %v1785_v21 = vpop.eup %1784 }
 0x857   : > { %v1160_v23 = vmul.f32 %v1785_v21, %v1152_v14 }
 0x859   : > { %v1167_v25 = vmul.f32 %v1532_v22, %v1160_v23 }
 0x85b   : > { %v1174_v26 = vadd.f32 %v1533_v24, %v1167_v25 }
 0x85d   : > { %v1175_v27 = vpack.c.bf16 %v1174_v26, %v1174_v26 }
 0x85f   : > { %1177 = vst.msk [vmem:[#allocation4] sm:$0xf] %vm1176_vm8, %v1175_v27 }
 0x866   : > { %v1179_v28 = vld [vmem:[#allocation4] sm:$0xf] }
 0x867   : > { %1658 = vmatmul.mubr.msk.bf16.vlgmr.msra.gmra.mrb[24].mxu0 %vm509_vm0, %v1179_v28 }
 0x93a   : > { %v1241_v38 = vpop.f32.mrb[24].mxu0 }
 0x93b   : > { %v1242_v39 = vadd.f32 %v1534_v37, %v1241_v38  ;;  %v1659_v40 = vpop.f32.mrb[25].mxu0 }
 0x93c   : > { %v1244_v41 = vpop.f32.mrb[26].mxu0 }
 0x93d   : > { %v1538_v42 = vmul.f32 -1.702, %v1242_v39  ;;  %v1660_v43 = vpop.f32.mrb[27].mxu0 }
 0x93f   : > { %v1249_v44 = vmul.f32 1.442695, %v1538_v42 }
 0x941   : > { %1786 = vpow2.f32 %v1249_v44 }
 0x94b   : > { %v1787_v45 = vpop.eup %1786 }
 0x94c   : > { %v1251_v8 = vadd.f32 1.0, %v1787_v45 }
 0x94e   : > { %1788 = vrcp.f32 %v1251_v8 }
 0x958   : > { %v1789_v46 = vpop.eup %1788 }
 0x959   : > { %v1254_v47 = vmul.f32 %v1789_v46, %v1242_v39 }
 0x95b   : > { %v1256_v48 = vpack.c.bf16 %v1254_v47, %v1254_v47 }
 0x95d   : > { %1678 = vmatmul.mubr.bf16.vlgmr.msra.gmra.mrb[16].mxu1 %v1256_v48 }
 0xa30   : > { %v1355_v50 = vpop.f32.mrb[16].mxu1 }
 0xa31   : > { %v1361_v51 = vadd.f32 %v1355_v50, %v1255_v49  ;;  %v1679_v52 = vpop.f32.mrb[17].mxu1 }
 0xa32   : > { %v1358_v53 = vpop.f32.mrb[18].mxu1 }
 0xa33   : > { %1362 = vst.msk [vmem:[#allocation5] sm:$0xff] %vm509_vm0, %v1361_v51  ;;  %v1680_v54 = vpop.f32.mrb[19].mxu1 }
 0xa3a   : > { %v1367_v56 = vld [vmem:[#allocation5] sm:$0xff] }
 0xa3b   : > { %v1368_v58 = vadd.f32 %v1367_v56, %v1366_v55 }
 0xa3d   : > { %v1376_v59 = vadd.f32 %v1547_v57, %v1368_v58 }
 0xa3f   : > { %1377 = vst.msk [vmem:[%s483_s23] sm:$0xff] %vm509_vm0, %v1376_v59 }
 0xa40   : > { %1803 = shalt.err (!%p1800_p5)
}
 0xa41   : > { %s1804_s1 = scalar_lea.hbm %s2188_s2, 128  ;;  %s1808_s23 = scalar_lea.hbm %s2249_s13, 256 }
 0xa42   : > { %p1805_p6 = scmp.ne.s32.totalorder %s2188_s2, %s1804_s1  ;;  %p1809_p10 = scmp.lt.u32.totalorder %s2188_s2, %s2249_s13 }
 0xa43   : > { %p1810_p11 = scmp.lt.u32.totalorder %s1808_s23, %s1804_s1  ;;  %p1812_p13 = scmp.lt.u32.totalorder %s1804_s1, %s2188_s2 }
 0xa44   : > { %p1806_p7 = pnand %p1805_p6, %p1997_p4 }
 0xa45   : > { %p1811_p12 = por %p1810_p11, %p1809_p10 }
 0xa46   : > { %p1807_p9 = pneg %p1806_p7 }
 0xa47   : > { %p1813_p0 = por %p1812_p13, %p1811_p12 }
 0xa49   : > { %p1814_p1 = pnand %p1813_p0, %p1807_p9 }
 0xa4b   : > { %1817 = shalt.err (!%p1814_p1)
}
 0xa4c   : > { %1681 = dma.vmem_to_hbm [thread:$0]  (%p1997_p4), %s2190_s24, 128, %s2188_s2, %s1379_s3  }
 0xa4d PF: > { %p1687_p2 = scmp.ge.s32.totalorder %s1868_s30, 2  ;;  %s1404_s17 = sand.u32 1, %s1848_s25  }
 0xa4e   : > { %s1405_s15 = scalar_lea.sflag [#allocation7], %s1404_s17 }
 0xa4f   : > { %p1684_p3 = pnand %p1687_p2, %p2004_p8 }
 0xa51   : > { %1843 = dma.done.wait (!%p1684_p3), %s1405_s15, 128  }
 0xa52   : > { %1845 = vsyncadd (!%p1684_p3), %s1405_s15, 4294967168  ;;  %s26_s30 = sadd.s32 1, %s1868_s30   ;;  %s2260_s25 = smov %s1852_s26 }
 0xa53   : > { %p23_p5 = scmp.ge.s32.totalorder %s26_s30, 4   ;;  %s2261_s26 = smov %s1856_s27 }
 0xa54   : > { %s2262_s27 = smov %s2010_s21  ;;  %s2263_s28 = smov %s1864_s29 }
 0xa55   : > { %s2264_s29 = smov %s2266_s16  ;;  %25 = sbr.rel (!%p23_p5) target bundleno = 9 (0x9), region = 124 }
 0xa5c   :  { %1410 = vsyncpa [#allocation7], 1 }
 0xa5d   :  { %1412 = vsyncpa [#allocation7 + $0x1], 1 }

// kernel: tpu_custom_call.1
= control target key start
LH: loop header
LB: loop body
LE: loop exit
PB: predicated region body
PF: predicated region fallthrough
CT: control target
= control target key end

     0   :  { %s2236_s0 = inlined_call_operand.vmem [shape: f32[2,8,32], index: 0, kind: input, shape index: {}]   ;;  %s2237_s1 = inlined_call_operand.vmem [shape: f32[1,32], index: 1, kind: input, shape index: {}]   ;;  %s2238_s2 = inlined_call_operand.vmem [shape: f32[1,32], index: 2, kind: input, shape index: {}]   ;;  %s2239_s3 = inlined_call_operand.vmem [shape: bf16[32,96], index: 3, kind: input, shape index: {}]   ;;  %s2240_s4 = inlined_call_operand.vmem [shape: f32[1,96], index: 4, kind: input, shape index: {}]   ;;  %s2241_s5 = inlined_call_operand.vmem [shape: bf16[32,32], index: 5, kind: input, shape index: {}]   ;;  %s2242_s6 = inlined_call_operand.vmem [shape: f32[1,32], index: 6, kind: input, shape index: {}]   ;;  %s2243_s7 = inlined_call_operand.vmem [shape: f32[1,32], index: 7, kind: input, shape index: {}]   ;;  %s2244_s8 = inlined_call_operand.vmem [shape: f32[1,32], index: 8, kind: input, shape index: {}]   ;;  %s2245_s9 = inlined_call_operand.vmem [shape: bf16[32,128], index: 9, kind: input, shape index: {}]   ;;  %s2246_s10 = inlined_call_operand.vmem [shape: f32[1,128], index: 10, kind: input, shape index: {}]   ;;  %s2247_s11 = inlined_call_operand.vmem [shape: bf16[128,32], index: 11, kind: input, shape index: {}]   ;;  %s2248_s12 = inlined_call_operand.vmem [shape: f32[1,32], index: 12, kind: input, shape index: {}]   ;;  %s2249_s13 = inlined_call_operand.hbm [shape: f32[2,8,32], index: 13, kind: output, shape index: {}]  }
   0x1   :  { %2250 = sst [smem:[#allocation9_spill]] %s2236_s0 }
   0x2   :  { %2251 = sst [smem:[#allocation10_spill]] %s2237_s1 }
   0x3   :  { %2252 = sst [smem:[#allocation11_spill]] %s2238_s2 }
   0x4   :  { %2253 = sst [smem:[#allocation12_spill]] %s2239_s3 }
   0x5   :  { %18 = vsyncpa [#allocation7], 0 }
   0x6   :  { %20 = vsyncpa [#allocation7 + $0x1], 0  ;;  %s1957_s25 = smov 0   ;;  %s1959_s26 = smov 0  }
   0x7   :  { %s1961_s27 = smov 0   ;;  %s1963_s28 = smov 0  }
   0x8   :  { %s1965_s29 = smov 0   ;;  %s1967_s30 = smov 0  }
   0x9 LB: > { %s1501_s14 = sadd.s32 4294967295, %s1868_s30   ;;  %s1502_s15 = sadd.s32 4294967294, %s1868_s30   ;;  %s1868_s30 = sphi %s1967_s30, %s26_s30   ;;  %s1864_s29 = sphi %s1965_s29, %s2264_s29   ;;  %s1860_s28 = sphi %s1963_s28, %s2263_s28   ;;  %s1856_s27 = sphi %s1961_s27, %s2262_s27   ;;  %s1852_s26 = sphi %s1959_s26, %s2261_s26   ;;  %s1848_s25 = sphi %s1957_s25, %s2260_s25  }
   0xa   : > { %s38_s16 = sadd.s32 1, %s1864_s29  ;;  %s338_s17 = sadd.s32 1, %s1856_s27 }
   0xb   : > { %p40_p0 = scmp.ge.s32.totalorder %s38_s16, 2  ;;  %p348_p1 = scmp.ne.s32.totalorder %s1856_s27, %s1852_s26 }
   0xc   : > { %p349_p2 = scmp.eq.s32.totalorder %s1501_s14, 1  ;;  %p354_p3 = scmp.ne.s32.totalorder %s1852_s26, %s1848_s25 }
   0xd   : > { %s2266_s16 = smov (%p40_p0, %s38_s16), 0  ;;  %p355_p5 = scmp.eq.s32.totalorder %s1502_s15, 1 }
   0xe   : > { %p1997_p4 = por %p349_p2, %p348_p1  ;;  %s335_s19 = ssub.s32 %s1864_s29, %s2266_s16 }
   0xf   : > { %p1508_p6 = scmp.ge.s32.totalorder %s1868_s30, 1  ;;  %p336_p7 = scmp.eq.s32.totalorder %s335_s19, 0 }
  0x10   : > { %p2004_p8 = por %p355_p5, %p354_p3  ;;  %p429_p9 = scmp.lt.s32.totalorder %s1868_s30, 3 }
  0x11   : > { %s2010_s21 = scalar_select %p336_p7, %s1856_s27, %s338_s17  }
  0x12   : > { %p430_p10 = pnand %p1508_p6, %p429_p9 }
  0x13   : > { %p484_p11 = scmp.lt.s32.totalorder (!%p430_p10), %s1860_s28, 1  ;;  %vm509_vm0 = vcmask (!%p430_p10), 261120   ;;  %s2256_s0 = sld [smem:[#allocation9_spill]] (!%p430_p10)  ;;  %v1870_v8 = vmov (!%p430_p10), 0.0   ;;  %vm1871_vm1 = vmmov (!%p430_p10), 0   ;;  %vm609_vm2 = vcmask (!%p430_p10), 64512  }
  0x14   : > { %433 = sbr.rel (%p430_p10) target bundleno = 2637 (0xa4d), region = 72  ;;  %s2257_s3 = sld [smem:[#allocation12_spill]] (!%p430_p10)  ;;  %1589 = vmatprep.subr.bf16.mxu0 (!%p430_p10), %v1870_v8  ;;  %1178 = vst.msk [vmem:[#allocation5] sm:$0xff] (!%p430_p10), %vm509_vm0, %v1870_v8  ;;  %1593 = vmatprep.mubr.msk.bf16.mxu0 (!%p430_p10), %vm1871_vm1, %v1870_v8  ;;  %v1513_v20 = vld [vmem:[%s2240_s4] ss:$0 sm:$0xff] (!%p430_p10)  ;;  %vm673_vm3 = vcmask (!%p430_p10), 1043456  }
  0x15   : > { %1609 = vmatprep.subr.bf16.mxu1 (!%p430_p10), %v1870_v8  ;;  %1611 = vmatprep.mubr.msk.bf16.mxu1 (!%p430_p10), %vm1871_vm1, %v1870_v8  ;;  %s2258_s1 = sld [smem:[#allocation10_spill]] (!%p430_p10)  ;;  %s2259_s2 = sld [smem:[#allocation11_spill]] (!%p430_p10)  ;;  %vm718_vm4 = vcmask (!%p430_p10), 60416   ;;  %vm837_vm5 = vcmask (!%p430_p10), 126016   ;;  %vm956_vm6 = vcmask (!%p430_p10), 191616   ;;  %vm1075_vm7 = vcmask (!%p430_p10), 257216  }
  0x16   : > { %s1873_s24 = smov (!%p430_p10), 96   ;;  %s1874_s14 = smov (!%p430_p10), 88   ;;  %vm1176_vm8 = vcmask (!%p430_p10), 257024  }
  0x17   : > { %s1876_s17 = smov (!%p430_p10), 112   ;;  %s1877_s19 = smov (!%p430_p10), 72  }
  0x1a   : > { %v1752_v7 = vld [vmem:[%s2257_s3] sm:$0xff] (!%p430_p10)   ;;  %v1753_v9 = vld [vmem:[%s2257_s3 + $0x8] sm:$0xff] (!%p430_p10)  }
  0x1b   : > { %s485_s22 = scalar_select %p484_p11, %s1860_s28, 1  ;;  %1590 = vmatpush3.bf16.msra.mxu0 %v1752_v7  ;;  %v1511_v14 = vld [vmem:[%s2258_s1] ss:$0 sm:$0xff] }
  0x1c   : > { %1591 = vmatprep.subr.bf16.mxu0 %v1870_v8  ;;  %v1512_v16 = vld [vmem:[%s2259_s2] ss:$0 sm:$0xff] }
  0x1d   : > { %s1510_s23 = sshll.u32 %s485_s22, 3  ;;  %s1878_s22 = smov 104  }
  0x1e   : > { %s487_s15 = scalar_lea.vmem %s2256_s0, %s1510_s23  ;;  %s1872_s23 = smov 120  }
  0x1f   : > { %v2017_v0 = vld [vmem:[%s487_s15] sm:$0xff]  ;;  %1592 = vmatpush3.bf16.msra.mxu0 %v1753_v9  ;;  %s1875_s15 = smov 80   ;;  %s481_s0 = sand.u32 1, %s1852_s26  }
  0x20   : > { %v510_v1 = vsel %vm509_vm0, %v2017_v0, 0.0  ;;  %1597 = vmatprep.subr.bf16.mxu0 %v1870_v8  ;;  %s1379_s3 = scalar_lea.sflag [#allocation7], %s481_s0 }
  0x21   : > { %511 = vadd.xlane.f32.xlu0 %v510_v1 }
  0xae   : > { %v512_v2 = vpop.xlane.xlu0 %511 }
  0xaf   : > { %v514_v3 = vmul.f32 0.03125, %v512_v2 }
  0xb1   : > { %v515_v4 = vsub.f32 %v2017_v0, %v514_v3 }
  0xb3   : > { %v516_v5 = vmul.f32 %v515_v4, %v515_v4 }
  0xb5   : > { %v517_v6 = vsel %vm509_vm0, %v516_v5, 0.0 }
  0xb6   : > { %518 = vadd.xlane.f32.xlu0 %v517_v6 }
 0x143   : > { %v519_v10 = vpop.xlane.xlu0 %518 }
 0x144   : > { %v520_v11 = vmul.f32 0.03125, %v519_v10 }
 0x146   : > { %v521_v12 = vadd.f32 1e-05, %v520_v11 }
 0x148   : > { %1766 = vrsqrt.f32 %v521_v12 }
 0x152   : > { %v1767_v13 = vpop.eup %1766 }
 0x153   : > { %v523_v15 = vmul.f32 %v1767_v13, %v515_v4 }
 0x155   : > { %v530_v17 = vmul.f32 %v1511_v14, %v523_v15 }
 0x157   : > { %v537_v18 = vadd.f32 %v1512_v16, %v530_v17 }
 0x159   : > { %v538_v19 = vpack.c.bf16 %v537_v18, %v537_v18 }
 0x15b   : > { %1594 = vmatmul.mubr.msk.bf16.vlgmr.msra.gmra.mrb[0].mxu0 %vm509_vm0, %v538_v19 }
 0x15c   : > { %1599 = vmatprep.mubr.msk.bf16.mxu0 %vm1871_vm1, %v1870_v8 }
 0x22e   : > { %v599_v21 = vpop.f32.mrb[0].mxu0 }
 0x22f   : > { %v600_v22 = vadd.f32 %v1513_v20, %v599_v21  ;;  %v1595_v23 = vpop.f32.mrb[1].mxu0 }
 0x230   : > { %v602_v24 = vpop.f32.mrb[2].mxu0 }
 0x231   : > { %v2051_v25 = vpack.c.bf16 %v600_v22, %v600_v22  ;;  %v1596_v26 = vpop.f32.mrb[3].mxu0 }
 0x233   : > { %720 = vrot.lane.b32.xlu0 %v2051_v25, %s1872_s23  ;;  %607 = vrot.lane.b32.xlu1 %v2051_v25, %s1873_s24  ;;  %s1879_s23 = smov 64   ;;  %s1880_s24 = smov 56  }
 0x237   : > { %722 = vrot.lane.b32.xlu1 %v2051_v25, %s1874_s14  ;;  %s1881_s14 = smov 48  }
 0x23b   : > { %841 = vrot.lane.b32.xlu1 %v2051_v25, %s1875_s15  ;;  %s1882_s15 = smov 40  }
 0x23f   : > { %839 = vrot.lane.b32.xlu1 %v2051_v25, %s1876_s17  ;;  %s1883_s17 = smov 8  }
 0x243   : > { %960 = vrot.lane.b32.xlu1 %v2051_v25, %s1877_s19 }
 0x247   : > { %958 = vrot.lane.b32.xlu1 %v2051_v25, %s1878_s22  ;;  %s1549_s22 = sshll.u32 %s1860_s28, 7  ;;  %s1886_s28 = smov [#allocation6]  }
 0x248   : > { %s2188_s2 = scalar_lea.hbm %s2249_s13, %s1549_s22 }
 0x2a5   : > { %v608_v27 = vpop.permute.xlu1 %607  ;;  %v721_v32 = vpop.permute.xlu0 %720 }
 0x2a6   : > { %v614_v28 = vsel %vm609_vm2, %v608_v27, 0 }
 0x2a7   : > { %1598 = vmatpush3.bf16.xpose.msra.mxu0 %v614_v28 }
 0x2a8   : > { %1603 = vmatprep.subr.bf16.mxu0 %v1870_v8 }
 0x2a9   : > { %v723_v29 = vpop.permute.xlu1 %722 }
 0x2aa   : > { %v728_v30 = vsel %vm609_vm2, %v723_v29, 0 }
 0x2ab   : > { %1610 = vmatpush3.bf16.xpose.msra.mxu1 %v728_v30 }
 0x2ac   : > { %1621 = vmatprep.subr.bf16.mxu1 %v1870_v8 }
 0x2ad   : > { %v842_v31 = vpop.permute.xlu1 %841 }
 0x2ae   : > { %1600 = vmatmul.mubr.msk.bf16.vlgmr.msra.gmra.mrb[4].mxu0 %vm609_vm2, %v2051_v25  ;;  %v847_v34 = vsel %vm609_vm2, %v842_v31, 0 }
 0x2af   : > { %1605 = vmatprep.mubr.msk.bf16.mxu0 %vm1871_vm1, %v1870_v8 }
 0x2b1   : > { %v840_v33 = vpop.permute.xlu1 %839 }
 0x2b2   : > { %1612 = vmatmul.mubr.msk.bf16.vlgmr.msra.gmra.mrb[0].mxu1 %vm609_vm2, %v721_v32 }
 0x2b3   : > { %1622 = vmatpush3.bf16.xpose.msra.mxu1 %v847_v34  ;;  %1623 = vmatprep.mubr.msk.bf16.mxu1 %vm1871_vm1, %v1870_v8 }
 0x2b4   : > { %1633 = vmatprep.subr.bf16.mxu1 %v1870_v8 }
 0x2b5   : > { %v961_v35 = vpop.permute.xlu1 %960 }
 0x2b6   : > { %v966_v36 = vsel %vm609_vm2, %v961_v35, 0 }
 0x2b9   : > { %v959_v37 = vpop.permute.xlu1 %958 }
 0x2ba   : > { %1624 = vmatmul.mubr.msk.bf16.vlgmr.msra.gmra.mrb[4].mxu1 %vm609_vm2, %v840_v33 }
 0x2bb   : > { %1634 = vmatpush3.bf16.xpose.msra.mxu1 %v966_v36  ;;  %1635 = vmatprep.mubr.msk.bf16.mxu1 %vm1871_vm1, %v1870_v8 }
 0x2bc   : > { %1645 = vmatprep.subr.bf16.mxu1 %v1870_v8 }
 0x2c2   : > { %1636 = vmatmul.mubr.msk.bf16.vlgmr.msra.gmra.mrb[8].mxu1 %vm609_vm2, %v959_v37 }
 0x2c3   : > { %1649 = vmatprep.mubr.msk.bf16.mxu1 %vm1871_vm1, %v1870_v8 }
 0x381   : > { %v650_v38 = vpop.f32.mrb[4].mxu0 }
 0x382   : > { %v1601_v39 = vpop.f32.mrb[5].mxu0  ;;  %v656_v40 = vsel %vm609_vm2, %v650_v38, -inf }
 0x383   : > { %657 = vmax.xlane.f32.xlu1 %v656_v40  ;;  %v653_v41 = vpop.f32.mrb[6].mxu0 }
 0x384   : > { %v1602_v42 = vpop.f32.mrb[7].mxu0 }
 0x385   : > { %v764_v43 = vpop.f32.mrb[0].mxu1 }
 0x386   : > { %v1613_v44 = vpop.f32.mrb[1].mxu1  ;;  %v770_v45 = vsel %vm609_vm2, %v764_v43, -inf }
 0x387   : > { %771 = vmax.xlane.f32.xlu0 %v770_v45  ;;  %v767_v46 = vpop.f32.mrb[2].mxu1 }
 0x388   : > { %v1614_v47 = vpop.f32.mrb[3].mxu1 }
 0x38d   : > { %v883_v48 = vpop.f32.mrb[4].mxu1 }
 0x38e   : > { %v1625_v49 = vpop.f32.mrb[5].mxu1  ;;  %v889_v50 = vsel %vm609_vm2, %v883_v48, -inf }
 0x38f   : > { %v886_v51 = vpop.f32.mrb[6].mxu1  ;;  %890 = vmax.xlane.f32.xlu1 %v889_v50  ;;  %v1754_v50 = vld [vmem:[%s2241_s5] sm:$0xff]  }
 0x390   : > { %v1626_v52 = vpop.f32.mrb[7].mxu1  ;;  %1646 = vmatpush3.bf16.msra.mxu1 %v1754_v50 }
 0x391   : > { %v1755_v52 = vld [vmem:[%s2241_s5 + $0x8] sm:$0xff]   ;;  %1647 = vmatprep.subr.bf16.mxu1 %v1870_v8 }
 0x394   : > { %1648 = vmatpush3.bf16.msra.mxu1 %v1755_v52 }
 0x395   : > { %v1002_v53 = vpop.f32.mrb[8].mxu1  ;;  %1661 = vmatprep.subr.bf16.mxu1 %v1870_v8 }
 0x396   : > { %v1637_v54 = vpop.f32.mrb[9].mxu1  ;;  %v1008_v55 = vsel %vm609_vm2, %v1002_v53, -inf }
 0x397   : > { %1009 = vmax.xlane.f32.xlu0 %v1008_v55  ;;  %v1005_v56 = vpop.f32.mrb[10].mxu1 }
 0x398   : > { %v1638_v57 = vpop.f32.mrb[11].mxu1 }
 0x410   : > { %v658_v58 = vpop.xlane.xlu1 %657 }
 0x411   : > { %v659_v59 = vsub.f32 %v650_v38, %v658_v58 }
 0x413   : > { %v660_v60 = vmul.f32 1.442695, %v659_v59 }
 0x414   : > { %v772_v61 = vpop.xlane.xlu0 %771 }
 0x415   : > { %1768 = vpow2.f32 %v660_v60  ;;  %v773_v62 = vsub.f32 %v764_v43, %v772_v61 }
 0x417   : > { %v774_v63 = vmul.f32 1.442695, %v773_v62 }
 0x419   : > { %1770 = vpow2.f32 %v774_v63 }
 0x41c   : > { %v891_v11 = vpop.xlane.xlu1 %890 }
 0x41d   : > { %v892_v12 = vsub.f32 %v883_v48, %v891_v11 }
 0x41f   : > { %v1769_v1 = vpop.eup %1768  ;;  %v893_v13 = vmul.f32 1.442695, %v892_v12 }
 0x420   : > { %v662_v2 = vsel %vm609_vm2, %v1769_v1, 0.0 }
 0x421   : > { %663 = vadd.xlane.f32.xlu1 %v662_v2 }
 0x423   : > { %v1771_v3 = vpop.eup %1770 }
 0x424   : > { %v1010_v4 = vpop.xlane.xlu0 %1009  ;;  %v776_v5 = vsel %vm609_vm2, %v1771_v3, 0.0 }
 0x425   : > { %v1011_v6 = vsub.f32 %v1002_v53, %v1010_v4  ;;  %777 = vadd.xlane.f32.xlu0 %v776_v5 }
 0x427   : > { %v1012_v7 = vmul.f32 1.442695, %v1011_v6 }
 0x429   : > { %1772 = vpow2.f32 %v1012_v7 }
 0x42a   : > { %1774 = vpow2.f32 %v893_v13 }
 0x432   : > { %668 = vrot.lane.b32.xlu1 %v2051_v25, %s1879_s23 }
 0x433   : > { %v1773_v9 = vpop.eup %1772 }
 0x434   : > { %v1014_v10 = vsel %vm609_vm2, %v1773_v9, 0.0  ;;  %v1775_v14 = vpop.eup %1774 }
 0x435   : > { %1015 = vadd.xlane.f32.xlu0 %v1014_v10  ;;  %v895_v15 = vsel %vm609_vm2, %v1775_v14, 0.0 }
 0x44b   : > { %782 = vrot.lane.b32.xlu0 %v2051_v25, %s1880_s24 }
 0x456   : > { %896 = vadd.xlane.f32.xlu1 %v895_v15 }
 0x467   : > { %901 = vrot.lane.b32.xlu1 %v2051_v25, %s1881_s14  ;;  %s1884_s14 = smov 16  }
 0x46b   : > { %1020 = vrot.lane.b32.xlu1 %v2051_v25, %s1882_s15  ;;  %s1885_s15 = smov 24  }
 0x4ae   : > { %v664_v16 = vpop.xlane.xlu1 %663 }
 0x4af   : > { %1776 = vrcp.f32 %v664_v16 }
 0x4b2   : > { %v669_v17 = vpop.permute.xlu1 %668  ;;  %v778_v19 = vpop.xlane.xlu0 %777 }
 0x4b3   : > { %v675_v18 = vsel %vm673_vm3, %v669_v17, 0  ;;  %1778 = vrcp.f32 %v778_v19  ;;  %v1756_v17 = vld [vmem:[%s2245_s9] sm:$0xff]  }
 0x4b4   : > { %1604 = vmatpush3.bf16.msra.mxu0 %v675_v18 }
 0x4b5   : > { %1615 = vmatprep.subr.bf16.mxu0 %v1870_v8 }
 0x4b9   : > { %v1777_v20 = vpop.eup %1776 }
 0x4ba   : > { %v666_v21 = vmul.f32 %v1777_v20, %v1769_v1 }
 0x4bc   : > { %v667_v22 = vpack.c.bf16 %v666_v21, %v666_v21 }
 0x4bd   : > { %v1779_v23 = vpop.eup %1778 }
 0x4be   : > { %1606 = vmatmul.mubr.msk.bf16.vlgmr.msra.gmra.mrb[8].mxu0 %vm609_vm2, %v667_v22  ;;  %v780_v25 = vmul.f32 %v1779_v23, %v1771_v3  ;;  %v1528_v3 = vld [vmem:[%s2242_s6] ss:$0 sm:$0xff] }
 0x4bf   : > { %1617 = vmatprep.mubr.msk.bf16.mxu0 %vm1871_vm1, %v1870_v8  ;;  %v1532_v22 = vld [vmem:[%s2243_s7] ss:$0 sm:$0xff] }
 0x4c0   : > { %v781_v28 = vpack.c.bf16 %v780_v25, %v780_v25 }
 0x4c2   : > { %v1016_v24 = vpop.xlane.xlu0 %1015 }
 0x4c6   : > { %v783_v26 = vpop.permute.xlu0 %782 }
 0x4c7   : > { %v788_v27 = vsel %vm673_vm3, %v783_v26, 0 }
 0x4c8   : > { %1616 = vmatpush3.bf16.msra.mxu0 %v788_v27 }
 0x4c9   : > { %1627 = vmatprep.subr.bf16.mxu0 %v1870_v8 }
 0x4cb   : > { %1618 = vmatmul.mubr.msk.bf16.vlgmr.msra.gmra.mrb[12].mxu0 %vm609_vm2, %v781_v28 }
 0x4cc   : > { %1629 = vmatprep.mubr.msk.bf16.mxu0 %vm1871_vm1, %v1870_v8 }
 0x4e3   : > { %v897_v29 = vpop.xlane.xlu1 %896 }
 0x4e4   : > { %1780 = vrcp.f32 %v897_v29  ;;  %v1758_v29 = vld [vmem:[%s2247_s11] sm:$0xff]  }
 0x4e5   : > { %1782 = vrcp.f32 %v1016_v24  ;;  %v1533_v24 = vld [vmem:[%s2244_s8] ss:$0 sm:$0xff] }
 0x4e7   : > { %v902_v30 = vpop.permute.xlu1 %901 }
 0x4e8   : > { %v907_v31 = vsel %vm673_vm3, %v902_v30, 0  ;;  %v1759_v30 = vld [vmem:[%s2247_s11 + $0x8] sm:$0xff]  }
 0x4e9   : > { %1628 = vmatpush3.bf16.msra.mxu0 %v907_v31  ;;  %v1760_v31 = vld [vmem:[%s2247_s11 + $0x10] sm:$0xff]  }
 0x4ea   : > { %1639 = vmatprep.subr.bf16.mxu0 %v1870_v8 }
 0x4eb   : > { %v1021_v34 = vpop.permute.xlu1 %1020 }
 0x4ec   : > { %v1026_v37 = vsel %vm673_vm3, %v1021_v34, 0  ;;  %v1763_v34 = vld [vmem:[%s2247_s11 + $0x28] sm:$0xff]  }
 0x4ee   : > { %v1781_v32 = vpop.eup %1780 }
 0x4ef   : > { %v899_v33 = vmul.f32 %v1781_v32, %v1775_v14  ;;  %v1783_v36 = vpop.eup %1782  ;;  %v1761_v32 = vld [vmem:[%s2247_s11 + $0x18] sm:$0xff]  }
 0x4f0   : > { %v1018_v38 = vmul.f32 %v1783_v36, %v1773_v9  ;;  %v1765_v36 = vld [vmem:[%s2247_s11 + $0x38] sm:$0xff]  }
 0x4f1   : > { %v900_v35 = vpack.c.bf16 %v899_v33, %v899_v33  ;;  %v1762_v33 = vld [vmem:[%s2247_s11 + $0x20] sm:$0xff]  }
 0x4f2   : > { %v1019_v39 = vpack.c.bf16 %v1018_v38, %v1018_v38 }
 0x4f3   : > { %1630 = vmatmul.mubr.msk.bf16.vlgmr.msra.gmra.mrb[16].mxu0 %vm609_vm2, %v900_v35  ;;  %v1764_v35 = vld [vmem:[%s2247_s11 + $0x30] sm:$0xff]  }
 0x4f4   : > { %1640 = vmatpush3.bf16.msra.mxu0 %v1026_v37  ;;  %1641 = vmatprep.mubr.msk.bf16.mxu0 %vm1871_vm1, %v1870_v8  ;;  %v1534_v37 = vld [vmem:[%s2246_s10] ss:$0 sm:$0xff] }
 0x4f5   : > { %1653 = vmatprep.subr.bf16.mxu0 %v1870_v8 }
 0x4fb   : > { %1642 = vmatmul.mubr.msk.bf16.vlgmr.msra.gmra.mrb[20].mxu0 %vm609_vm2, %v1019_v39 }
 0x4fc   : > { %1657 = vmatprep.mubr.msk.bf16.mxu0 %vm1871_vm1, %v1870_v8  ;;  %1654 = vmatpush3.bf16.msra.mxu0 %v1756_v17 }
 0x4fd   : > { %1655 = vmatprep.subr.bf16.mxu0 %v1870_v8 }
 0x591   : > { %v711_v40 = vpop.f32.mrb[8].mxu0 }
 0x592   : > { %v717_v41 = vpack.c.bf16 %v711_v40, %v711_v40  ;;  %v1607_v42 = vpop.f32.mrb[9].mxu0 }
 0x593   : > { %v714_v43 = vpop.f32.mrb[10].mxu0 }
 0x594   : > { %719 = vst.msk [vmem:[#allocation2] sm:$0xf] %vm718_vm4, %v717_v41  ;;  %v1608_v44 = vpop.f32.mrb[11].mxu0 }
 0x59e   : > { %v824_v45 = vpop.f32.mrb[12].mxu0 }
 0x59f   : > { %v1552_v46 = vpack.c.bf16 %v824_v45, %v824_v45  ;;  %v1619_v47 = vpop.f32.mrb[13].mxu0 }
 0x5a0   : > { %v827_v48 = vpop.f32.mrb[14].mxu0 }
 0x5a1   : > { %834 = vrot.lane.b32.xlu0 %v1552_v46, %s1883_s17  ;;  %v1620_v49 = vpop.f32.mrb[15].mxu0 }
 0x5a2   : > { %v1255_v49 = vld [vmem:[#allocation5] sm:$0xff] }
 0x5c6   : > { %v943_v51 = vpop.f32.mrb[16].mxu0 }
 0x5c7   : > { %v1553_v53 = vpack.c.bf16 %v943_v51, %v943_v51  ;;  %v1631_v54 = vpop.f32.mrb[17].mxu0 }
 0x5c8   : > { %v946_v55 = vpop.f32.mrb[18].mxu0 }
 0x5c9   : > { %953 = vrot.lane.b32.xlu1 %v1553_v53, %s1884_s14  ;;  %v1632_v56 = vpop.f32.mrb[19].mxu0 }
 0x5ce   : > { %v1062_v57 = vpop.f32.mrb[20].mxu0 }
 0x5cf   : > { %v1554_v58 = vpack.c.bf16 %v1062_v57, %v1062_v57  ;;  %v1643_v59 = vpop.f32.mrb[21].mxu0  ;;  %v1547_v57 = vld [vmem:[%s2248_s12] ss:$0 sm:$0xff] }
 0x5d0   : > { %v1065_v60 = vpop.f32.mrb[22].mxu0 }
 0x5d1   : > { %1072 = vrot.lane.b32.xlu0 %v1554_v58, %s1885_s15  ;;  %v1644_v61 = vpop.f32.mrb[23].mxu0  ;;  %s1509_s15 = sshll.u32 %s481_s0, 3 }
 0x5d2   : > { %s483_s23 = scalar_lea.vmem [#allocation6], %s1509_s15  ;;  %s1794_s15 = sshll.u32 %s1886_s28, 4  ;;  %s1795_s15 = int_to_ptr.vmem [resolvable:$false] %s1794_s15 }
 0x5d3   : > { %s1392_s24 = sshll.u32 %s483_s23, 4  ;;  %s1796_s19 = scalar_lea.vmem %s1795_s15, 256  ;;  %s2190_s24 = int_to_ptr.vmem [resolvable:$true] %s1392_s24 }
 0x5d4   : > { %s1790_s17 = scalar_lea.vmem %s2190_s24, 128  ;;  %p1797_p1 = scmp.lt.s32.totalorder %s2190_s24, %s1795_s15 }
 0x5d5   : > { %p1791_p12 = scmp.ne.s32.totalorder %s2190_s24, %s1790_s17  ;;  %p1798_p2 = scmp.lt.s32.totalorder %s1796_s19, %s1790_s17 }
 0x5d7   : > { %p1792_p13 = pnand %p1791_p12, %p1997_p4  ;;  %p1799_p3 = por %p1798_p2, %p1797_p1 }
 0x5d9   : > { %p1793_p0 = pneg %p1792_p13 }
 0x5db   : > { %p1800_p5 = pnand %p1799_p3, %p1793_p0 }
 0x613   : > { %v835_v62 = vpop.permute.xlu0 %834 }
 0x614   : > { %838 = vst.msk [vmem:[#allocation2] sm:$0xf] %vm837_vm5, %v835_v62 }
 0x63b   : > { %v954_v63 = vpop.permute.xlu1 %953 }
 0x63c   : > { %957 = vst.msk [vmem:[#allocation2] sm:$0xf] %vm956_vm6, %v954_v63 }
 0x643   : > { %v1073_v1 = vpop.permute.xlu0 %1072 }
 0x644   : > { %1076 = vst.msk [vmem:[#allocation2] sm:$0xf] %vm1075_vm7, %v1073_v1 }
 0x64b   : > { %v1077_v2 = vld [vmem:[#allocation2] sm:$0xf] }
 0x64c   : > { %1650 = vmatmul.mubr.msk.bf16.vlgmr.msra.gmra.mrb[12].mxu1 %vm509_vm0, %v1077_v2 }
 0x64d   : > { %1677 = vmatprep.mubr.msk.bf16.mxu1 %vm1871_vm1, %v1870_v8  ;;  %1662 = vmatpush3.bf16.msra.mxu1 %v1758_v29 }
 0x64e   : > { %1663 = vmatprep.subr.bf16.mxu1 %v1870_v8 }
 0x651   : > { %1664 = vmatpush3.bf16.msra.mxu1 %v1759_v30 }
 0x652   : > { %1665 = vmatprep.subr.bf16.mxu1 %v1870_v8 }
 0x655   : > { %1666 = vmatpush3.bf16.msra.mxu1 %v1760_v31 }
 0x656   : > { %1667 = vmatprep.subr.bf16.mxu1 %v1870_v8 }
 0x659   : > { %1668 = vmatpush3.bf16.msra.mxu1 %v1761_v32 }
 0x65a   : > { %1669 = vmatprep.subr.bf16.mxu1 %v1870_v8 }
 0x65d   : > { %1670 = vmatpush3.bf16.msra.mxu1 %v1762_v33 }
 0x65e   : > { %1671 = vmatprep.subr.bf16.mxu1 %v1870_v8 }
 0x661   : > { %1672 = vmatpush3.bf16.msra.mxu1 %v1763_v34 }
 0x662   : > { %1673 = vmatprep.subr.bf16.mxu1 %v1870_v8 }
 0x665   : > { %1674 = vmatpush3.bf16.msra.mxu1 %v1764_v35 }
 0x666   : > { %1675 = vmatprep.subr.bf16.mxu1 %v1870_v8 }
 0x669   : > { %1676 = vmatpush3.bf16.msra.mxu1 %v1765_v36 }
 0x71f   : > { %v1138_v4 = vpop.f32.mrb[12].mxu1 }
 0x720   : > { %v1139_v5 = vadd.f32 %v1528_v3, %v1138_v4  ;;  %v1651_v6 = vpop.f32.mrb[13].mxu1 }
 0x721   : > { %v1141_v7 = vpop.f32.mrb[14].mxu1 }
 0x722   : > { %v1144_v9 = vadd.f32 %v1139_v5, %v2017_v0  ;;  %v1652_v10 = vpop.f32.mrb[15].mxu1  ;;  %v1757_v0 = vld [vmem:[%s2245_s9 + $0x8] sm:$0xff]  }
 0x723   : > { %1656 = vmatpush3.bf16.msra.mxu0 %v1757_v0 }
 0x724   : > { %1145 = vst.msk [vmem:[#allocation3] sm:$0xff] %vm509_vm0, %v1144_v9  ;;  %v1148_v11 = vsel %vm509_vm0, %v1144_v9, 0.0 }
 0x725   : > { %1149 = vadd.xlane.f32.xlu1 %v1148_v11 }
 0x72b   : > { %v1366_v55 = vld [vmem:[#allocation3] sm:$0xff] }
 0x7b2   : > { %v1150_v12 = vpop.xlane.xlu1 %1149 }
 0x7b3   : > { %v1151_v13 = vmul.f32 0.03125, %v1150_v12 }
 0x7b5   : > { %v1152_v14 = vsub.f32 %v1144_v9, %v1151_v13 }
 0x7b7   : > { %v1153_v15 = vmul.f32 %v1152_v14, %v1152_v14 }
 0x7b9   : > { %v1154_v16 = vsel %vm509_vm0, %v1153_v15, 0.0 }
 0x7ba   : > { %1155 = vadd.xlane.f32.xlu0 %v1154_v16 }
 0x847   : > { %v1156_v18 = vpop.xlane.xlu0 %1155 }
 0x848   : > { %v1157_v19 = vmul.f32 0.03125, %v1156_v18 }
 0x84a   : > { %v1158_v20 = vadd.f32 1e-05, %v1157_v19 }
 0x84c   : > { %1784 = vrsqrt.f32 %v1158_v20 }
 0x856   : > { %v1785_v21 = vpop.eup %1784 }
 0x857   : > { %v1160_v23 = vmul.f32 %v1785_v21, %v1152_v14 }
 0x859   : > { %v1167_v25 = vmul.f32 %v1532_v22, %v1160_v23 }
 0x85b   : > { %v1174_v26 = vadd.f32 %v1533_v24, %v1167_v25 }
 0x85d   : > { %v1175_v27 = vpack.c.bf16 %v1174_v26, %v1174_v26 }
 0x85f   : > { %1177 = vst.msk [vmem:[#allocation4] sm:$0xf] %vm1176_vm8, %v1175_v27 }
 0x866   : > { %v1179_v28 = vld [vmem:[#allocation4] sm:$0xf] }
 0x867   : > { %1658 = vmatmul.mubr.msk.bf16.vlgmr.msra.gmra.mrb[24].mxu0 %vm509_vm0, %v1179_v28 }
 0x93a   : > { %v1241_v38 = vpop.f32.mrb[24].mxu0 }
 0x93b   : > { %v1242_v39 = vadd.f32 %v1534_v37, %v1241_v38  ;;  %v1659_v40 = vpop.f32.mrb[25].mxu0 }
 0x93c   : > { %v1244_v41 = vpop.f32.mrb[26].mxu0 }
 0x93d   : > { %v1538_v42 = vmul.f32 -1.702, %v1242_v39  ;;  %v1660_v43 = vpop.f32.mrb[27].mxu0 }
 0x93f   : > { %v1249_v44 = vmul.f32 1.442695, %v1538_v42 }
 0x941   : > { %1786 = vpow2.f32 %v1249_v44 }
 0x94b   : > { %v1787_v45 = vpop.eup %1786 }
 0x94c   : > { %v1251_v8 = vadd.f32 1.0, %v1787_v45 }
 0x94e   : > { %1788 = vrcp.f32 %v1251_v8 }
 0x958   : > { %v1789_v46 = vpop.eup %1788 }
 0x959   : > { %v1254_v47 = vmul.f32 %v1789_v46, %v1242_v39 }
 0x95b   : > { %v1256_v48 = vpack.c.bf16 %v1254_v47, %v1254_v47 }
 0x95d   : > { %1678 = vmatmul.mubr.bf16.vlgmr.msra.gmra.mrb[16].mxu1 %v1256_v48 }
 0xa30   : > { %v1355_v50 = vpop.f32.mrb[16].mxu1 }
 0xa31   : > { %v1361_v51 = vadd.f32 %v1355_v50, %v1255_v49  ;;  %v1679_v52 = vpop.f32.mrb[17].mxu1 }
 0xa32   : > { %v1358_v53 = vpop.f32.mrb[18].mxu1 }
 0xa33   : > { %1362 = vst.msk [vmem:[#allocation5] sm:$0xff] %vm509_vm0, %v1361_v51  ;;  %v1680_v54 = vpop.f32.mrb[19].mxu1 }
 0xa3a   : > { %v1367_v56 = vld [vmem:[#allocation5] sm:$0xff] }
 0xa3b   : > { %v1368_v58 = vadd.f32 %v1367_v56, %v1366_v55 }
 0xa3d   : > { %v1376_v59 = vadd.f32 %v1547_v57, %v1368_v58 }
 0xa3f   : > { %1377 = vst.msk [vmem:[%s483_s23] sm:$0xff] %vm509_vm0, %v1376_v59 }
 0xa40   : > { %1803 = shalt.err (!%p1800_p5)
}
 0xa41   : > { %s1804_s1 = scalar_lea.hbm %s2188_s2, 128  ;;  %s1808_s23 = scalar_lea.hbm %s2249_s13, 256 }
 0xa42   : > { %p1805_p6 = scmp.ne.s32.totalorder %s2188_s2, %s1804_s1  ;;  %p1809_p10 = scmp.lt.u32.totalorder %s2188_s2, %s2249_s13 }
 0xa43   : > { %p1810_p11 = scmp.lt.u32.totalorder %s1808_s23, %s1804_s1  ;;  %p1812_p13 = scmp.lt.u32.totalorder %s1804_s1, %s2188_s2 }
 0xa44   : > { %p1806_p7 = pnand %p1805_p6, %p1997_p4 }
 0xa45   : > { %p1811_p12 = por %p1810_p11, %p1809_p10 }
 0xa46   : > { %p1807_p9 = pneg %p1806_p7 }
 0xa47   : > { %p1813_p0 = por %p1812_p13, %p1811_p12 }
 0xa49   : > { %p1814_p1 = pnand %p1813_p0, %p1807_p9 }
 0xa4b   : > { %1817 = shalt.err (!%p1814_p1)
}
 0xa4c   : > { %1681 = dma.vmem_to_hbm [thread:$0]  (%p1997_p4), %s2190_s24, 128, %s2188_s2, %s1379_s3  }
 0xa4d PF: > { %p1687_p2 = scmp.ge.s32.totalorder %s1868_s30, 2  ;;  %s1404_s17 = sand.u32 1, %s1848_s25  }
 0xa4e   : > { %s1405_s15 = scalar_lea.sflag [#allocation7], %s1404_s17 }
 0xa4f   : > { %p1684_p3 = pnand %p1687_p2, %p2004_p8 }
 0xa51   : > { %1843 = dma.done.wait (!%p1684_p3), %s1405_s15, 128  }
 0xa52   : > { %1845 = vsyncadd (!%p1684_p3), %s1405_s15, 4294967168  ;;  %s26_s30 = sadd.s32 1, %s1868_s30   ;;  %s2260_s25 = smov %s1852_s26 }
 0xa53   : > { %p23_p5 = scmp.ge.s32.totalorder %s26_s30, 4   ;;  %s2261_s26 = smov %s1856_s27 }
 0xa54   : > { %s2262_s27 = smov %s2010_s21  ;;  %s2263_s28 = smov %s1864_s29 }
 0xa55   : > { %s2264_s29 = smov %s2266_s16  ;;  %25 = sbr.rel (!%p23_p5) target bundleno = 9 (0x9), region = 124 }
 0xa5c   :  { %1410 = vsyncpa [#allocation7], 1 }
 0xa5d   :  { %1412 = vsyncpa [#allocation7 + $0x1], 1 }

</bundles_post_ra>
